<compile_context>
chip_gen: v6e
topology: v6e:2x2x1
jax: 0.10.0
libtpu: 0.0.40
codegen_flags: <defaults>
</compile_context>

<pallas_src>
import functools

import jax
import jax.numpy as jnp
import numpy as np
from jax import lax
from jax.experimental import pallas as pl
from jax.experimental.pallas import tpu as pltpu


# Phase -> tuple of (shift_index, tap_index).
#   shifts: 0 -> x[a, b], 1 -> x[a, b+1], 2 -> x[a+1, b], 3 -> x[a+1, b+1]
#   tap_index = kh*3 + kw into the spatially flipped conv-transpose weight.
# Derived from: o[2a+rp, 2b+cp] = sum over taps whose dilated-input row/col is
# non-zero for that output parity.
_PHASE_TAPS = (
    ((0, 4),),                          # phase (0,0): x00 * wf[1,1]
    ((0, 3), (1, 5)),                   # phase (0,1): x00*wf[1,0] + x01*wf[1,2]
    ((0, 1), (2, 7)),                   # phase (1,0): x00*wf[0,1] + x10*wf[2,1]
    ((0, 0), (1, 2), (2, 6), (3, 8)),   # phase (1,1): 4 corner taps
)


# ---------------------------------------------------------------------------
# VMEM sizing helpers
# ---------------------------------------------------------------------------
@functools.lru_cache(maxsize=1)
def _vmem_capacity_bytes():
    try:
        return int(pltpu.get_tpu_info().vmem_capacity_bytes)
    except Exception:
        return 64 << 20   # conservative fallback: v7x per-TensorCore VMEM


def _pass1_vmem_bytes(TH, W, Cin, Cout):
    """Working-set estimate for one conv-pass grid step (incl. temporaries)."""
    M = TH * W
    xm = TH * (W + 1) * Cin * 2          # main input block (bf16)
    xh = (W + 1) * Cin * 2               # halo row block (bf16)
    wts = 9 * Cin * Cout * 2             # weights (bf16)
    slab = 4 * M * Cout * 2              # pre-norm output block (bf16)
    stats = 2 * Cout * 4                 # per-tile sum/sumsq (f32)
    dbuf = 2 * (xm + xh + wts + slab + stats)   # double-buffered pipeline blocks
    shifts = 4 * M * Cin * 2             # four materialized shifted slabs (bf16)
    temps = 3 * M * Cout * 4             # f32 matmul accumulators in flight
    return dbuf + shifts + temps


def _pick_row_tile(H, W, Cin, Cout, budget):
    """Largest row-tile TH dividing H that fits `budget`; prefer >= 2 tiles."""
    divisors = sorted((d for d in range(1, H + 1) if H % d == 0), reverse=True)
    for want_multi in (True, False):
        for th in divisors:
            if want_multi and H // th < 2:
                continue
            if _pass1_vmem_bytes(th, W, Cin, Cout) <= budget:
                return th
    return 1


# ---------------------------------------------------------------------------
# Pass 1: sub-pixel transposed conv (per batch, per row tile)
# ---------------------------------------------------------------------------
def _up_conv_kernel(xm_ref, xh_ref, w_ref, slab_ref, stats_ref):
    # xm_ref:   (1, TH, W+1, Cin)  bf16  rows [t*TH, t*TH+TH) of the padded input
    # xh_ref:   (1, 1,  W+1, Cin)  bf16  halo row t*TH+TH (zero row for last tile)
    # w_ref:    (9, Cin, Cout)     bf16  flipped conv-transpose weights, taps flat
    # slab_ref: (1, 4, TH, W, Cout) bf16 pre-norm phase-separated output block
    # stats_ref:(1, 1, 2, Cout)    f32   per-tile [sum, sum-of-squares]
    TH = xm_ref.shape[1]
    Cin = xm_ref.shape[3]
    W = slab_ref.shape[3]
    Cout = slab_ref.shape[4]
    M = TH * W

    def shifted(rs, cs):
        # Flattened (M, Cin) slab of x[a+rs, b+cs] for a in [0,TH), b in [0,W).
        if rs == 0:
            return xm_ref[0, :, cs:cs + W, :].reshape(M, Cin)
        tail = xh_ref[0, :, cs:cs + W, :].reshape(W, Cin)
        if TH == 1:
            return tail
        body = xm_ref[0, 1:TH, cs:cs + W, :].reshape((TH - 1) * W, Cin)
        return jnp.concatenate([body, tail], axis=0)

    # The four sub-pixel shifted slabs, materialized once per tile and reused.
    shifts = (shifted(0, 0), shifted(0, 1), shifted(1, 0), shifted(1, 1))

    # Conv (bias intentionally omitted: it cancels in affine=False InstanceNorm)
    # + one-pass per-channel sum / sum-of-squares over the bf16-rounded values,
    # so pass 2 normalizes exactly the statistics of what was stored.
    ssum = jnp.zeros((1, Cout), jnp.float32)
    ssq = jnp.zeros((1, Cout), jnp.float32)
    for phase, taps in enumerate(_PHASE_TAPS):
        acc = None
        for (si, ti) in taps:
            d = lax.dot_general(
                shifts[si], w_ref[ti],
                dimension_numbers=(((1,), (0,)), ((), ())),
                preferred_element_type=jnp.float32)
            acc = d if acc is None else acc + d
        res_bf = acc.astype(jnp.bfloat16)
        slab_ref[0, phase] = res_bf.reshape(TH, W, Cout)
        rf = res_bf.astype(jnp.float32)
        ssum = ssum + jnp.sum(rf, axis=0, keepdims=True)
        ssq = ssq + jnp.sum(rf * rf, axis=0, keepdims=True)

    stats_ref[0, 0, 0:1, :] = ssum
    stats_ref[0, 0, 1:2, :] = ssq


# ---------------------------------------------------------------------------
# Pass 2: normalize + ReLU over a lane-dense (..., W*Cout) view
# ---------------------------------------------------------------------------
def _up_norm_kernel(slab_ref, ms_ref, out_ref):
    # slab_ref: (1, 4, TH, W*Cout) bf16 ; ms_ref: (1, 2, W*Cout) f32 [mean, inv_std]
    # out_ref:  (1, 4, TH, W*Cout) bf16
    WC = slab_ref.shape[3]
    v = slab_ref[0].astype(jnp.float32)
    mean = ms_ref[0, 0:1, :].reshape(1, 1, WC)
    inv_std = ms_ref[0, 1:2, :].reshape(1, 1, WC)
    y = (v - mean) * inv_std
    out_ref[0] = jnp.maximum(y, 0.0).astype(jnp.bfloat16)


# ---------------------------------------------------------------------------
# Wrapper
# ---------------------------------------------------------------------------
@jax.jit
def up_forward(x_nchw, weight_pt, bias):
    """Up.forward. x_nchw: (N, Cin, H, W); weight_pt: (Cin, Cout, 3, 3) PyTorch
    ConvTranspose2d layout; bias: (Cout,). Returns (N, Cout, 2H, 2W) float32."""
    N, Cin, H, W = x_nchw.shape
    Cout = weight_pt.shape[1]

    # bias is mathematically a no-op under InstanceNorm2d(affine=False); skip it.
    # (If the norm layer ever has an affine/running-stats path, re-add it here.)
    del bias

    # NCHW -> NHWC, cast to bf16, and one zero row/col of high-side padding
    # (covers the x[a+1]/x[b+1] sub-pixel neighbours at the image border and the
    # halo row of the last H tile).
    x = jnp.transpose(x_nchw, (0, 2, 3, 1)).astype(jnp.bfloat16)
    xpad = jnp.pad(x, ((0, 0), (0, 1), (0, 1), (0, 0)))

    # (Cin, Cout, kh, kw) -> (kh, kw, Cin, Cout), spatial flip, taps flattened.
    w = jnp.transpose(weight_pt, (2, 3, 0, 1))[::-1, ::-1]
    w = w.reshape(9, Cin, Cout).astype(jnp.bfloat16)

    # Generation-aware tiling & VMEM limit.
    cap = _vmem_capacity_bytes()
    TH = _pick_row_tile(H, W, Cin, Cout, budget=int(0.35 * cap))
    T = H // TH
    est = _pass1_vmem_bytes(TH, W, Cin, Cout)
    vmem_limit = int(min(int(0.85 * cap), max(32 << 20, est + (4 << 20))))
    cparams = pltpu.CompilerParams(
        dimension_semantics=("parallel", "parallel"),
        vmem_limit_bytes=vmem_limit)

    # ---- Pass 1: tiled conv + per-tile stats partials ----------------------
    slab, stats = pl.pallas_call(
        _up_conv_kernel,
        out_shape=(jax.ShapeDtypeStruct((N, 4, H, W, Cout), jnp.bfloat16),
                   jax.ShapeDtypeStruct((N, T, 2, Cout), jnp.float32)),
        grid_spec=pltpu.PrefetchScalarGridSpec(
            num_scalar_prefetch=0,
            grid=(N, T),
            in_specs=[
                # main rows [t*TH, t*TH+TH)
                pl.BlockSpec((1, TH, W + 1, Cin), lambda n, t: (n, t, 0, 0)),
                # halo row t*TH+TH (same array, 1-row block, element index)
                pl.BlockSpec((1, 1, W + 1, Cin),
                             lambda n, t: (n, (t + 1) * TH, 0, 0)),
                pl.BlockSpec((9, Cin, Cout), lambda n, t: (0, 0, 0)),
            ],
            out_specs=[
                pl.BlockSpec((1, 4, TH, W, Cout), lambda n, t: (n, 0, t, 0, 0)),
                pl.BlockSpec((1, 1, 2, Cout), lambda n, t: (n, t, 0, 0)),
            ],
        ),
        compiler_params=cparams,
    )(xpad, xpad, w)

    # ---- Tiny stats reduction (a few KB) in XLA ----------------------------
    tot = jnp.sum(stats, axis=1)                       # (N, 2, Cout)
    inv_cnt = 1.0 / (4.0 * H * W)
    mean = tot[:, 0, :] * inv_cnt                      # (N, Cout)
    var = tot[:, 1, :] * inv_cnt - mean * mean
    var = jnp.maximum(var, 0.0)                        # E[x^2]-mean^2 cancellation guard
    inv_std = lax.rsqrt(var + jnp.float32(1e-5))
    ms = jnp.stack([mean, inv_std], axis=1)            # (N, 2, Cout)
    WC = W * Cout
    ms_b = jnp.broadcast_to(ms[:, :, None, :], (N, 2, W, Cout)).reshape(N, 2, WC)

    # ---- Pass 2: tiled normalize + ReLU, lane-dense last dim ---------------
    slab2 = slab.reshape(N, 4, H, WC)                  # free (contiguous) reshape
    out2 = pl.pallas_call(
        _up_norm_kernel,
        out_shape=jax.ShapeDtypeStruct((N, 4, H, WC), jnp.bfloat16),
        grid_spec=pltpu.PrefetchScalarGridSpec(
            num_scalar_prefetch=0,
            grid=(N, T),
            in_specs=[
                pl.BlockSpec((1, 4, TH, WC), lambda n, t: (n, 0, t, 0)),
                pl.BlockSpec((1, 2, WC), lambda n, t: (n, 0, 0)),
            ],
            out_specs=pl.BlockSpec((1, 4, TH, WC), lambda n, t: (n, 0, t, 0)),
        ),
        compiler_params=cparams,
    )(slab2, ms_b)

    # (N, 4 = 2*rp+cp, H, W, Cout) -> (N, Cout, 2H, 2W): the 2x2 phase interleave
    # is folded into the NHWC->NCHW transpose, executed on bf16 and fused with the
    # final f32 cast by XLA.
    # TODO(synk): fold this interleave/transpose into the pass-2 kernel.
    out = out2.reshape(N, 2, 2, H, W, Cout)
    out = jnp.transpose(out, (0, 5, 3, 1, 4, 2))       # (N, Cout, H, 2, W, 2)
    return out.reshape(N, Cout, 2 * H, 2 * W).astype(jnp.float32)


# ---------------------------------------------------------------------------
# Pure-JAX reference (XLA dilated-conv path) for validation
# ---------------------------------------------------------------------------
def up_reference(x_nchw, weight_pt, bias):
    Cout = weight_pt.shape[1]
    w_oihw = jnp.transpose(weight_pt, (1, 0, 2, 3))[:, :, ::-1, ::-1].astype(jnp.bfloat16)
    y = jax.lax.conv_general_dilated(
        x_nchw.astype(jnp.bfloat16), w_oihw,
        window_strides=(1, 1), padding=[(1, 2), (1, 2)],
        lhs_dilation=(2, 2), rhs_dilation=(1, 1),
        dimension_numbers=("NCHW", "OIHW", "NCHW"),
        preferred_element_type=jnp.float32)
    y = y + bias.reshape(1, Cout, 1, 1).astype(jnp.float32)
    mean = jnp.mean(y, axis=(2, 3), keepdims=True)
    var = jnp.mean((y - mean) ** 2, axis=(2, 3), keepdims=True)
    y = (y - mean) * jax.lax.rsqrt(var + 1e-5)
    return jnp.maximum(y, 0.0)


if __name__ == "__main__":
    key = jax.random.PRNGKey(0)
    k_x, k_w, k_b = jax.random.split(key, 3)

    N, in_ch, out_ch, H, W = 2, 4, 8, 16, 16
    x = jax.random.normal(k_x, (N, in_ch, H, W), dtype=jnp.float32)
    # PyTorch ConvTranspose2d weight shape: (in_ch, out_ch, kH, kW)
    weight = jax.random.normal(k_w, (in_ch, out_ch, 3, 3), dtype=jnp.float32) * 0.1
    bias = jax.random.normal(k_b, (out_ch,), dtype=jnp.float32) * 0.1

    out = jax.block_until_ready(up_forward(x, weight, bias))
    ref = jax.block_until_ready(up_reference(x, weight, bias))

    assert out.shape == (N, out_ch, 2 * H, 2 * W), out.shape
    # bf16-grade tolerance: the pre-norm slab and the normalized output are
    # stored in bf16 (stats / normalization math stays f32).
    np.testing.assert_allclose(np.asarray(out), np.asarray(ref),
                               rtol=1e-2, atol=1e-2)
    print("KERNEL_OK")
</pallas_src>

<mosaic_0001>
module attributes {stable_mosaic.version = 11 : i64} {
  func.func @_up_conv_kernel(%arg0: i32, %arg1: i32, %arg2: memref<1x8x17x4xbf16, #tpu.memory_space<vmem>>, %arg3: memref<1x1x17x4xbf16, #tpu.memory_space<vmem>>, %arg4: memref<9x4x8xbf16, #tpu.memory_space<vmem>>, %arg5: memref<1x4x8x16x8xbf16, #tpu.memory_space<vmem>>, %arg6: memref<1x1x2x8xf32, #tpu.memory_space<vmem>>) attributes {dimension_semantics = [#tpu.dimension_semantics<parallel>, #tpu.dimension_semantics<parallel>], iteration_bounds = array<i64: 2, 2>, scalar_prefetch = 0 : i64, scratch_operands = 0 : i64, tpu.core_type = #tpu.core_type<tc>, window_params = [{transform_indices = @transform_0, window_bounds = array<i64: 1, 8, 17, 4>}, {transform_indices = @transform_1, window_bounds = array<i64: 1, 1, 17, 4>}, {pipeline_mode = #tpu.pipeline_mode<synchronous>, transform_indices = @transform_2, window_bounds = array<i64: 9, 4, 8>}, {transform_indices = @transform_3, window_bounds = array<i64: 1, 4, 8, 16, 8>}, {transform_indices = @transform_4, window_bounds = array<i64: 1, 1, 2, 8>}]} {
    %c0 = arith.constant 0 : index
    %c0_0 = arith.constant 0 : index
    %c0_1 = arith.constant 0 : index
    %c0_2 = arith.constant 0 : index
    %0 = vector.load %arg2[%c0, %c0_0, %c0_1, %c0_2] : memref<1x8x17x4xbf16, #tpu.memory_space<vmem>>, vector<1x8x16x4xbf16>
    %1 = vector.shape_cast %0 : vector<1x8x16x4xbf16> to vector<8x16x4xbf16>
    %2 = vector.shape_cast %1 : vector<8x16x4xbf16> to vector<128x4xbf16>
    %c0_3 = arith.constant 0 : index
    %c0_4 = arith.constant 0 : index
    %c1 = arith.constant 1 : index
    %c0_5 = arith.constant 0 : index
    %3 = vector.load %arg2[%c0_3, %c0_4, %c1, %c0_5] : memref<1x8x17x4xbf16, #tpu.memory_space<vmem>>, vector<1x8x16x4xbf16>
    %4 = vector.shape_cast %3 : vector<1x8x16x4xbf16> to vector<8x16x4xbf16>
    %5 = vector.shape_cast %4 : vector<8x16x4xbf16> to vector<128x4xbf16>
    %c0_6 = arith.constant 0 : index
    %c0_7 = arith.constant 0 : index
    %c0_8 = arith.constant 0 : index
    %c0_9 = arith.constant 0 : index
    %6 = vector.load %arg3[%c0_6, %c0_7, %c0_8, %c0_9] : memref<1x1x17x4xbf16, #tpu.memory_space<vmem>>, vector<1x1x16x4xbf16>
    %7 = vector.shape_cast %6 : vector<1x1x16x4xbf16> to vector<1x16x4xbf16>
    %8 = vector.shape_cast %7 : vector<1x16x4xbf16> to vector<16x4xbf16>
    %c0_10 = arith.constant 0 : index
    %c1_11 = arith.constant 1 : index
    %c0_12 = arith.constant 0 : index
    %c0_13 = arith.constant 0 : index
    %9 = vector.load %arg2[%c0_10, %c1_11, %c0_12, %c0_13] : memref<1x8x17x4xbf16, #tpu.memory_space<vmem>>, vector<1x7x16x4xbf16>
    %10 = vector.shape_cast %9 : vector<1x7x16x4xbf16> to vector<7x16x4xbf16>
    %11 = vector.shape_cast %10 : vector<7x16x4xbf16> to vector<112x4xbf16>
    %12 = tpu.concatenate %11, %8 in 0 : vector<112x4xbf16>, vector<16x4xbf16> -> vector<128x4xbf16>
    %c0_14 = arith.constant 0 : index
    %c0_15 = arith.constant 0 : index
    %c1_16 = arith.constant 1 : index
    %c0_17 = arith.constant 0 : index
    %13 = vector.load %arg3[%c0_14, %c0_15, %c1_16, %c0_17] : memref<1x1x17x4xbf16, #tpu.memory_space<vmem>>, vector<1x1x16x4xbf16>
    %14 = vector.shape_cast %13 : vector<1x1x16x4xbf16> to vector<1x16x4xbf16>
    %15 = vector.shape_cast %14 : vector<1x16x4xbf16> to vector<16x4xbf16>
    %c0_18 = arith.constant 0 : index
    %c1_19 = arith.constant 1 : index
    %c1_20 = arith.constant 1 : index
    %c0_21 = arith.constant 0 : index
    %16 = vector.load %arg2[%c0_18, %c1_19, %c1_20, %c0_21] : memref<1x8x17x4xbf16, #tpu.memory_space<vmem>>, vector<1x7x16x4xbf16>
    %17 = vector.shape_cast %16 : vector<1x7x16x4xbf16> to vector<7x16x4xbf16>
    %18 = vector.shape_cast %17 : vector<7x16x4xbf16> to vector<112x4xbf16>
    %19 = tpu.concatenate %18, %15 in 0 : vector<112x4xbf16>, vector<16x4xbf16> -> vector<128x4xbf16>
    %cst = arith.constant 0.000000e+00 : f32
    %20 = vector.broadcast %cst : f32 to vector<1x8xf32>
    %cst_22 = arith.constant 0.000000e+00 : f32
    %21 = vector.broadcast %cst_22 : f32 to vector<1x8xf32>
    %c4 = arith.constant 4 : index
    %c0_23 = arith.constant 0 : index
    %c0_24 = arith.constant 0 : index
    %22 = vector.load %arg4[%c4, %c0_23, %c0_24] : memref<9x4x8xbf16, #tpu.memory_space<vmem>>, vector<1x4x8xbf16>
    %23 = vector.shape_cast %22 : vector<1x4x8xbf16> to vector<4x8xbf16>
    %cst_25 = arith.constant dense<0.000000e+00> : vector<128x8xf32>
    %24 = tpu.matmul %2, %23, %cst_25 {dimension_numbers = #tpu.dot_dimension_numbers<[1], [0], [0], [1], [0, 0, 1, 1], [], []>} : vector<128x4xbf16>, vector<4x8xbf16>, vector<128x8xf32> -> vector<128x8xf32>
    %25 = arith.truncf %24 : vector<128x8xf32> to vector<128x8xbf16>
    %26 = vector.shape_cast %25 : vector<128x8xbf16> to vector<8x16x8xbf16>
    %c0_26 = arith.constant 0 : index
    %c0_27 = arith.constant 0 : index
    %c0_28 = arith.constant 0 : index
    %c0_29 = arith.constant 0 : index
    %c0_30 = arith.constant 0 : index
    %27 = vector.load %arg5[%c0_26, %c0_27, %c0_28, %c0_29, %c0_30] : memref<1x4x8x16x8xbf16, #tpu.memory_space<vmem>>, vector<1x1x8x16x8xbf16>
    %28 = vector.shape_cast %27 : vector<1x1x8x16x8xbf16> to vector<8x16x8xbf16>
    %29 = vector.shape_cast %26 : vector<8x16x8xbf16> to vector<1x1x8x16x8xbf16>
    tpu.vector_store %arg5[%c0_26, %c0_27, %c0_28, %c0_29, %c0_30], %29 {strides = array<i32>} : memref<1x4x8x16x8xbf16, #tpu.memory_space<vmem>>, vector<1x1x8x16x8xbf16>,
    %30 = arith.extf %25 : vector<128x8xbf16> to vector<128x8xf32>
    %cst_31 = arith.constant dense<0.000000e+00> : vector<8xf32>
    %31 = vector.multi_reduction <add>, %30, %cst_31 [0] : vector<128x8xf32> to vector<8xf32>
    %32 = vector.shape_cast %31 : vector<8xf32> to vector<1x8xf32>
    %33 = arith.addf %20, %32 : vector<1x8xf32>
    %34 = arith.mulf %30, %30 : vector<128x8xf32>
    %cst_32 = arith.constant dense<0.000000e+00> : vector<8xf32>
    %35 = vector.multi_reduction <add>, %34, %cst_32 [0] : vector<128x8xf32> to vector<8xf32>
    %36 = vector.shape_cast %35 : vector<8xf32> to vector<1x8xf32>
    %37 = arith.addf %21, %36 : vector<1x8xf32>
    %c3 = arith.constant 3 : index
    %c0_33 = arith.constant 0 : index
    %c0_34 = arith.constant 0 : index
    %38 = vector.load %arg4[%c3, %c0_33, %c0_34] : memref<9x4x8xbf16, #tpu.memory_space<vmem>>, vector<1x4x8xbf16>
    %39 = vector.shape_cast %38 : vector<1x4x8xbf16> to vector<4x8xbf16>
    %cst_35 = arith.constant dense<0.000000e+00> : vector<128x8xf32>
    %40 = tpu.matmul %2, %39, %cst_35 {dimension_numbers = #tpu.dot_dimension_numbers<[1], [0], [0], [1], [0, 0, 1, 1], [], []>} : vector<128x4xbf16>, vector<4x8xbf16>, vector<128x8xf32> -> vector<128x8xf32>
    %c5 = arith.constant 5 : index
    %c0_36 = arith.constant 0 : index
    %c0_37 = arith.constant 0 : index
    %41 = vector.load %arg4[%c5, %c0_36, %c0_37] : memref<9x4x8xbf16, #tpu.memory_space<vmem>>, vector<1x4x8xbf16>
    %42 = vector.shape_cast %41 : vector<1x4x8xbf16> to vector<4x8xbf16>
    %cst_38 = arith.constant dense<0.000000e+00> : vector<128x8xf32>
    %43 = tpu.matmul %5, %42, %cst_38 {dimension_numbers = #tpu.dot_dimension_numbers<[1], [0], [0], [1], [0, 0, 1, 1], [], []>} : vector<128x4xbf16>, vector<4x8xbf16>, vector<128x8xf32> -> vector<128x8xf32>
    %44 = arith.addf %40, %43 : vector<128x8xf32>
    %45 = arith.truncf %44 : vector<128x8xf32> to vector<128x8xbf16>
    %46 = vector.shape_cast %45 : vector<128x8xbf16> to vector<8x16x8xbf16>
    %c0_39 = arith.constant 0 : index
    %c1_40 = arith.constant 1 : index
    %c0_41 = arith.constant 0 : index
    %c0_42 = arith.constant 0 : index
    %c0_43 = arith.constant 0 : index
    %47 = vector.load %arg5[%c0_39, %c1_40, %c0_41, %c0_42, %c0_43] : memref<1x4x8x16x8xbf16, #tpu.memory_space<vmem>>, vector<1x1x8x16x8xbf16>
    %48 = vector.shape_cast %47 : vector<1x1x8x16x8xbf16> to vector<8x16x8xbf16>
    %49 = vector.shape_cast %46 : vector<8x16x8xbf16> to vector<1x1x8x16x8xbf16>
    tpu.vector_store %arg5[%c0_39, %c1_40, %c0_41, %c0_42, %c0_43], %49 {strides = array<i32>} : memref<1x4x8x16x8xbf16, #tpu.memory_space<vmem>>, vector<1x1x8x16x8xbf16>,
    %50 = arith.extf %45 : vector<128x8xbf16> to vector<128x8xf32>
    %cst_44 = arith.constant dense<0.000000e+00> : vector<8xf32>
    %51 = vector.multi_reduction <add>, %50, %cst_44 [0] : vector<128x8xf32> to vector<8xf32>
    %52 = vector.shape_cast %51 : vector<8xf32> to vector<1x8xf32>
    %53 = arith.addf %33, %52 : vector<1x8xf32>
    %54 = arith.mulf %50, %50 : vector<128x8xf32>
    %cst_45 = arith.constant dense<0.000000e+00> : vector<8xf32>
    %55 = vector.multi_reduction <add>, %54, %cst_45 [0] : vector<128x8xf32> to vector<8xf32>
    %56 = vector.shape_cast %55 : vector<8xf32> to vector<1x8xf32>
    %57 = arith.addf %37, %56 : vector<1x8xf32>
    %c1_46 = arith.constant 1 : index
    %c0_47 = arith.constant 0 : index
    %c0_48 = arith.constant 0 : index
    %58 = vector.load %arg4[%c1_46, %c0_47, %c0_48] : memref<9x4x8xbf16, #tpu.memory_space<vmem>>, vector<1x4x8xbf16>
    %59 = vector.shape_cast %58 : vector<1x4x8xbf16> to vector<4x8xbf16>
    %cst_49 = arith.constant dense<0.000000e+00> : vector<128x8xf32>
    %60 = tpu.matmul %2, %59, %cst_49 {dimension_numbers = #tpu.dot_dimension_numbers<[1], [0], [0], [1], [0, 0, 1, 1], [], []>} : vector<128x4xbf16>, vector<4x8xbf16>, vector<128x8xf32> -> vector<128x8xf32>
    %c7 = arith.constant 7 : index
    %c0_50 = arith.constant 0 : index
    %c0_51 = arith.constant 0 : index
    %61 = vector.load %arg4[%c7, %c0_50, %c0_51] : memref<9x4x8xbf16, #tpu.memory_space<vmem>>, vector<1x4x8xbf16>
    %62 = vector.shape_cast %61 : vector<1x4x8xbf16> to vector<4x8xbf16>
    %cst_52 = arith.constant dense<0.000000e+00> : vector<128x8xf32>
    %63 = tpu.matmul %12, %62, %cst_52 {dimension_numbers = #tpu.dot_dimension_numbers<[1], [0], [0], [1], [0, 0, 1, 1], [], []>} : vector<128x4xbf16>, vector<4x8xbf16>, vector<128x8xf32> -> vector<128x8xf32>
    %64 = arith.addf %60, %63 : vector<128x8xf32>
    %65 = arith.truncf %64 : vector<128x8xf32> to vector<128x8xbf16>
    %66 = vector.shape_cast %65 : vector<128x8xbf16> to vector<8x16x8xbf16>
    %c0_53 = arith.constant 0 : index
    %c2 = arith.constant 2 : index
    %c0_54 = arith.constant 0 : index
    %c0_55 = arith.constant 0 : index
    %c0_56 = arith.constant 0 : index
    %67 = vector.load %arg5[%c0_53, %c2, %c0_54, %c0_55, %c0_56] : memref<1x4x8x16x8xbf16, #tpu.memory_space<vmem>>, vector<1x1x8x16x8xbf16>
    %68 = vector.shape_cast %67 : vector<1x1x8x16x8xbf16> to vector<8x16x8xbf16>
    %69 = vector.shape_cast %66 : vector<8x16x8xbf16> to vector<1x1x8x16x8xbf16>
    tpu.vector_store %arg5[%c0_53, %c2, %c0_54, %c0_55, %c0_56], %69 {strides = array<i32>} : memref<1x4x8x16x8xbf16, #tpu.memory_space<vmem>>, vector<1x1x8x16x8xbf16>,
    %70 = arith.extf %65 : vector<128x8xbf16> to vector<128x8xf32>
    %cst_57 = arith.constant dense<0.000000e+00> : vector<8xf32>
    %71 = vector.multi_reduction <add>, %70, %cst_57 [0] : vector<128x8xf32> to vector<8xf32>
    %72 = vector.shape_cast %71 : vector<8xf32> to vector<1x8xf32>
    %73 = arith.addf %53, %72 : vector<1x8xf32>
    %74 = arith.mulf %70, %70 : vector<128x8xf32>
    %cst_58 = arith.constant dense<0.000000e+00> : vector<8xf32>
    %75 = vector.multi_reduction <add>, %74, %cst_58 [0] : vector<128x8xf32> to vector<8xf32>
    %76 = vector.shape_cast %75 : vector<8xf32> to vector<1x8xf32>
    %77 = arith.addf %57, %76 : vector<1x8xf32>
    %c0_59 = arith.constant 0 : index
    %c0_60 = arith.constant 0 : index
    %c0_61 = arith.constant 0 : index
    %78 = vector.load %arg4[%c0_59, %c0_60, %c0_61] : memref<9x4x8xbf16, #tpu.memory_space<vmem>>, vector<1x4x8xbf16>
    %79 = vector.shape_cast %78 : vector<1x4x8xbf16> to vector<4x8xbf16>
    %cst_62 = arith.constant dense<0.000000e+00> : vector<128x8xf32>
    %80 = tpu.matmul %2, %79, %cst_62 {dimension_numbers = #tpu.dot_dimension_numbers<[1], [0], [0], [1], [0, 0, 1, 1], [], []>} : vector<128x4xbf16>, vector<4x8xbf16>, vector<128x8xf32> -> vector<128x8xf32>
    %c2_63 = arith.constant 2 : index
    %c0_64 = arith.constant 0 : index
    %c0_65 = arith.constant 0 : index
    %81 = vector.load %arg4[%c2_63, %c0_64, %c0_65] : memref<9x4x8xbf16, #tpu.memory_space<vmem>>, vector<1x4x8xbf16>
    %82 = vector.shape_cast %81 : vector<1x4x8xbf16> to vector<4x8xbf16>
    %cst_66 = arith.constant dense<0.000000e+00> : vector<128x8xf32>
    %83 = tpu.matmul %5, %82, %cst_66 {dimension_numbers = #tpu.dot_dimension_numbers<[1], [0], [0], [1], [0, 0, 1, 1], [], []>} : vector<128x4xbf16>, vector<4x8xbf16>, vector<128x8xf32> -> vector<128x8xf32>
    %84 = arith.addf %80, %83 : vector<128x8xf32>
    %c6 = arith.constant 6 : index
    %c0_67 = arith.constant 0 : index
    %c0_68 = arith.constant 0 : index
    %85 = vector.load %arg4[%c6, %c0_67, %c0_68] : memref<9x4x8xbf16, #tpu.memory_space<vmem>>, vector<1x4x8xbf16>
    %86 = vector.shape_cast %85 : vector<1x4x8xbf16> to vector<4x8xbf16>
    %cst_69 = arith.constant dense<0.000000e+00> : vector<128x8xf32>
    %87 = tpu.matmul %12, %86, %cst_69 {dimension_numbers = #tpu.dot_dimension_numbers<[1], [0], [0], [1], [0, 0, 1, 1], [], []>} : vector<128x4xbf16>, vector<4x8xbf16>, vector<128x8xf32> -> vector<128x8xf32>
    %88 = arith.addf %84, %87 : vector<128x8xf32>
    %c8 = arith.constant 8 : index
    %c0_70 = arith.constant 0 : index
    %c0_71 = arith.constant 0 : index
    %89 = vector.load %arg4[%c8, %c0_70, %c0_71] : memref<9x4x8xbf16, #tpu.memory_space<vmem>>, vector<1x4x8xbf16>
    %90 = vector.shape_cast %89 : vector<1x4x8xbf16> to vector<4x8xbf16>
    %cst_72 = arith.constant dense<0.000000e+00> : vector<128x8xf32>
    %91 = tpu.matmul %19, %90, %cst_72 {dimension_numbers = #tpu.dot_dimension_numbers<[1], [0], [0], [1], [0, 0, 1, 1], [], []>} : vector<128x4xbf16>, vector<4x8xbf16>, vector<128x8xf32> -> vector<128x8xf32>
    %92 = arith.addf %88, %91 : vector<128x8xf32>
    %93 = arith.truncf %92 : vector<128x8xf32> to vector<128x8xbf16>
    %94 = vector.shape_cast %93 : vector<128x8xbf16> to vector<8x16x8xbf16>
    %c0_73 = arith.constant 0 : index
    %c3_74 = arith.constant 3 : index
    %c0_75 = arith.constant 0 : index
    %c0_76 = arith.constant 0 : index
    %c0_77 = arith.constant 0 : index
    %95 = vector.load %arg5[%c0_73, %c3_74, %c0_75, %c0_76, %c0_77] : memref<1x4x8x16x8xbf16, #tpu.memory_space<vmem>>, vector<1x1x8x16x8xbf16>
    %96 = vector.shape_cast %95 : vector<1x1x8x16x8xbf16> to vector<8x16x8xbf16>
    %97 = vector.shape_cast %94 : vector<8x16x8xbf16> to vector<1x1x8x16x8xbf16>
    tpu.vector_store %arg5[%c0_73, %c3_74, %c0_75, %c0_76, %c0_77], %97 {strides = array<i32>} : memref<1x4x8x16x8xbf16, #tpu.memory_space<vmem>>, vector<1x1x8x16x8xbf16>,
    %98 = arith.extf %93 : vector<128x8xbf16> to vector<128x8xf32>
    %cst_78 = arith.constant dense<0.000000e+00> : vector<8xf32>
    %99 = vector.multi_reduction <add>, %98, %cst_78 [0] : vector<128x8xf32> to vector<8xf32>
    %100 = vector.shape_cast %99 : vector<8xf32> to vector<1x8xf32>
    %101 = arith.addf %73, %100 : vector<1x8xf32>
    %102 = arith.mulf %98, %98 : vector<128x8xf32>
    %cst_79 = arith.constant dense<0.000000e+00> : vector<8xf32>
    %103 = vector.multi_reduction <add>, %102, %cst_79 [0] : vector<128x8xf32> to vector<8xf32>
    %104 = vector.shape_cast %103 : vector<8xf32> to vector<1x8xf32>
    %105 = arith.addf %77, %104 : vector<1x8xf32>
    %c0_80 = arith.constant 0 : index
    %c0_81 = arith.constant 0 : index
    %c0_82 = arith.constant 0 : index
    %c0_83 = arith.constant 0 : index
    %106 = vector.load %arg6[%c0_80, %c0_81, %c0_82, %c0_83] : memref<1x1x2x8xf32, #tpu.memory_space<vmem>>, vector<1x1x1x8xf32>
    %107 = vector.shape_cast %106 : vector<1x1x1x8xf32> to vector<1x8xf32>
    %108 = vector.shape_cast %101 : vector<1x8xf32> to vector<1x1x1x8xf32>
    tpu.vector_store %arg6[%c0_80, %c0_81, %c0_82, %c0_83], %108 {strides = array<i32>} : memref<1x1x2x8xf32, #tpu.memory_space<vmem>>, vector<1x1x1x8xf32>,
    %c0_84 = arith.constant 0 : index
    %c0_85 = arith.constant 0 : index
    %c1_86 = arith.constant 1 : index
    %c0_87 = arith.constant 0 : index
    %109 = vector.load %arg6[%c0_84, %c0_85, %c1_86, %c0_87] : memref<1x1x2x8xf32, #tpu.memory_space<vmem>>, vector<1x1x1x8xf32>
    %110 = vector.shape_cast %109 : vector<1x1x1x8xf32> to vector<1x8xf32>
    %111 = vector.shape_cast %105 : vector<1x8xf32> to vector<1x1x1x8xf32>
    tpu.vector_store %arg6[%c0_84, %c0_85, %c1_86, %c0_87], %111 {strides = array<i32>} : memref<1x1x2x8xf32, #tpu.memory_space<vmem>>, vector<1x1x1x8xf32>,
    return
  }
  func.func @transform_0(%arg0: i32, %arg1: i32) -> (i32, i32, i32, i32) {
    %c0_i32 = arith.constant 0 : i32
    %c0_i32_0 = arith.constant 0 : i32
    %c0_i32_1 = arith.constant 0 : i32
    return %arg0, %arg1, %c0_i32, %c0_i32_0 : i32, i32, i32, i32
  }
  func.func @transform_1(%arg0: i32, %arg1: i32) -> (i32, i32, i32, i32) {
    %c1_i32 = arith.constant 1 : i32
    %0 = arith.addi %arg1, %c1_i32 : i32
    %c8_i32 = arith.constant 8 : i32
    %1 = arith.muli %0, %c8_i32 : i32
    %c0_i32 = arith.constant 0 : i32
    %c0_i32_0 = arith.constant 0 : i32
    %c0_i32_1 = arith.constant 0 : i32
    return %arg0, %1, %c0_i32, %c0_i32_0 : i32, i32, i32, i32
  }
  func.func @transform_2(%arg0: i32, %arg1: i32) -> (i32, i32, i32) {
    %c0_i32 = arith.constant 0 : i32
    %c0_i32_0 = arith.constant 0 : i32
    %c0_i32_1 = arith.constant 0 : i32
    %c0_i32_2 = arith.constant 0 : i32
    return %c0_i32, %c0_i32_0, %c0_i32_1 : i32, i32, i32
  }
  func.func @transform_3(%arg0: i32, %arg1: i32) -> (i32, i32, i32, i32, i32) {
    %c0_i32 = arith.constant 0 : i32
    %c0_i32_0 = arith.constant 0 : i32
    %c0_i32_1 = arith.constant 0 : i32
    %c0_i32_2 = arith.constant 0 : i32
    return %arg0, %c0_i32, %arg1, %c0_i32_0, %c0_i32_1 : i32, i32, i32, i32, i32
  }
  func.func @transform_4(%arg0: i32, %arg1: i32) -> (i32, i32, i32, i32) {
    %c0_i32 = arith.constant 0 : i32
    %c0_i32_0 = arith.constant 0 : i32
    %c0_i32_1 = arith.constant 0 : i32
    return %arg0, %arg1, %c0_i32, %c0_i32_0 : i32, i32, i32, i32
  }
}

module attributes {stable_mosaic.version = 11 : i64} {
  func.func @_up_norm_kernel(%arg0: i32, %arg1: i32, %arg2: memref<1x4x8x128xbf16, #tpu.memory_space<vmem>>, %arg3: memref<1x2x128xf32, #tpu.memory_space<vmem>>, %arg4: memref<1x4x8x128xbf16, #tpu.memory_space<vmem>>) attributes {dimension_semantics = [#tpu.dimension_semantics<parallel>, #tpu.dimension_semantics<parallel>], iteration_bounds = array<i64: 2, 2>, scalar_prefetch = 0 : i64, scratch_operands = 0 : i64, tpu.core_type = #tpu.core_type<tc>, window_params = [{transform_indices = @transform_0, window_bounds = array<i64: 1, 4, 8, 128>}, {transform_indices = @transform_1, window_bounds = array<i64: 1, 2, 128>}, {transform_indices = @transform_2, window_bounds = array<i64: 1, 4, 8, 128>}]} {
    %c0 = arith.constant 0 : index
    %c0_0 = arith.constant 0 : index
    %c0_1 = arith.constant 0 : index
    %c0_2 = arith.constant 0 : index
    %0 = vector.load %arg2[%c0, %c0_0, %c0_1, %c0_2] : memref<1x4x8x128xbf16, #tpu.memory_space<vmem>>, vector<1x4x8x128xbf16>
    %1 = vector.shape_cast %0 : vector<1x4x8x128xbf16> to vector<4x8x128xbf16>
    %2 = arith.extf %1 : vector<4x8x128xbf16> to vector<4x8x128xf32>
    %c0_3 = arith.constant 0 : index
    %c0_4 = arith.constant 0 : index
    %c0_5 = arith.constant 0 : index
    %3 = vector.load %arg3[%c0_3, %c0_4, %c0_5] : memref<1x2x128xf32, #tpu.memory_space<vmem>>, vector<1x1x128xf32>
    %4 = vector.shape_cast %3 : vector<1x1x128xf32> to vector<1x128xf32>
    %5 = vector.shape_cast %4 : vector<1x128xf32> to vector<1x1x128xf32>
    %c0_6 = arith.constant 0 : index
    %c1 = arith.constant 1 : index
    %c0_7 = arith.constant 0 : index
    %6 = vector.load %arg3[%c0_6, %c1, %c0_7] : memref<1x2x128xf32, #tpu.memory_space<vmem>>, vector<1x1x128xf32>
    %7 = vector.shape_cast %6 : vector<1x1x128xf32> to vector<1x128xf32>
    %8 = vector.shape_cast %7 : vector<1x128xf32> to vector<1x1x128xf32>
    %9 = vector.broadcast %5 : vector<1x1x128xf32> to vector<4x8x128xf32>
    %10 = arith.subf %2, %9 : vector<4x8x128xf32>
    %11 = vector.broadcast %8 : vector<1x1x128xf32> to vector<4x8x128xf32>
    %12 = arith.mulf %10, %11 : vector<4x8x128xf32>
    %cst = arith.constant 0.000000e+00 : f32
    %13 = vector.broadcast %cst : f32 to vector<4x8x128xf32>
    %14 = arith.maximumf %12, %13 : vector<4x8x128xf32>
    %15 = arith.truncf %14 : vector<4x8x128xf32> to vector<4x8x128xbf16>
    %c0_8 = arith.constant 0 : index
    %c0_9 = arith.constant 0 : index
    %c0_10 = arith.constant 0 : index
    %c0_11 = arith.constant 0 : index
    %16 = vector.load %arg4[%c0_8, %c0_9, %c0_10, %c0_11] : memref<1x4x8x128xbf16, #tpu.memory_space<vmem>>, vector<1x4x8x128xbf16>
    %17 = vector.shape_cast %16 : vector<1x4x8x128xbf16> to vector<4x8x128xbf16>
    %18 = vector.shape_cast %15 : vector<4x8x128xbf16> to vector<1x4x8x128xbf16>
    tpu.vector_store %arg4[%c0_8, %c0_9, %c0_10, %c0_11], %18 {strides = array<i32>} : memref<1x4x8x128xbf16, #tpu.memory_space<vmem>>, vector<1x4x8x128xbf16>,
    return
  }
  func.func @transform_0(%arg0: i32, %arg1: i32) -> (i32, i32, i32, i32) {
    %c0_i32 = arith.constant 0 : i32
    %c0_i32_0 = arith.constant 0 : i32
    %c0_i32_1 = arith.constant 0 : i32
    return %arg0, %c0_i32, %arg1, %c0_i32_0 : i32, i32, i32, i32
  }
  func.func @transform_1(%arg0: i32, %arg1: i32) -> (i32, i32, i32) {
    %c0_i32 = arith.constant 0 : i32
    %c0_i32_0 = arith.constant 0 : i32
    %c0_i32_1 = arith.constant 0 : i32
    return %arg0, %c0_i32, %c0_i32_0 : i32, i32, i32
  }
  func.func @transform_2(%arg0: i32, %arg1: i32) -> (i32, i32, i32, i32) {
    %c0_i32 = arith.constant 0 : i32
    %c0_i32_0 = arith.constant 0 : i32
    %c0_i32_1 = arith.constant 0 : i32
    return %arg0, %c0_i32, %arg1, %c0_i32_0 : i32, i32, i32, i32
  }
}

</mosaic_0001>

<bundles_post_ra>
// kernel: up_forward.3
= control target key start
LH: loop header
LB: loop body
LE: loop exit
PB: predicated region body
PF: predicated region fallthrough
CT: control target
= control target key end

     0   :  { %s579_s9 = smov 0   ;;  %s581_s10 = smov 0   ;;  %s680_s0 = inlined_call_operand.vmem [shape: bf16[2,4,16,128], index: 0, kind: input, shape index: {}]   ;;  %s681_s1 = inlined_call_operand.vmem [shape: f32[2,2,128], index: 1, kind: input, shape index: {}]   ;;  %s682_s2 = inlined_call_operand.vmem [shape: bf16[2,4,16,128], index: 2, kind: output, shape index: {}]  }
   0x1   :  { %s583_s11 = smov 0   ;;  %s585_s12 = smov 0  }
   0x2   :  { %s587_s13 = smov 0   ;;  %s589_s14 = smov 0  }
   0x3   :  { %s591_s15 = smov 0  }
   0x4 LB: > { %s21_s16 = sadd.s32 1, %s554_s13  ;;  %s24_s17 = sadd.s32 1, %s558_s14  ;;  %s562_s15 = sphi %s591_s15, %s12_s15   ;;  %s558_s14 = sphi %s589_s14, %s689_s14   ;;  %s554_s13 = sphi %s587_s13, %s688_s13   ;;  %s550_s12 = sphi %s585_s12, %s687_s12   ;;  %s546_s11 = sphi %s583_s11, %s686_s11   ;;  %s542_s10 = sphi %s581_s10, %s685_s10   ;;  %s538_s9 = sphi %s579_s9, %s684_s9  }
   0x5   : > { %p22_p0 = scmp.ge.s32.totalorder %s21_s16, 2  ;;  %s414_s18 = sadd.s32 4294967295, %s562_s15  }
   0x6   : > { %p40_p1 = scmp.ne.s32.totalorder %s542_s10, %s538_s9  ;;  %p41_p2 = scmp.eq.s32.totalorder %s562_s15, 0 }
   0x7   : > { %s691_s16 = smov (%p22_p0, %s21_s16), 0  ;;  %s693_s17 = smov (!%p22_p0, %s24_s17), %s558_s14 }
   0x8   : > { %p26_p3 = scmp.ge.s32.totalorder %s693_s17, 2  ;;  %p98_p4 = scmp.eq.s32.totalorder %s414_s18, 3 }
   0x9   : > { %s29_s19 = ssub.s32 %s554_s13, %s691_s16  ;;  %p42_p5 = por %p41_p2, %p40_p1 }
   0xa   : > { %s695_s17 = smov (%p26_p3, %s693_s17), 0  ;;  %p627_p6 = por %p98_p4, %p40_p1 }
   0xb   : > { %s28_s21 = ssub.s32 %s558_s14, %s695_s17  ;;  %s33_s23 = sadd.s32 1, %s542_s10 }
   0xc   : > { %s30_s22 = sor.u32 %s29_s19, %s28_s21  ;;  %p417_p8 = scmp.ge.s32.totalorder %s562_s15, 4 }
   0xd   : > { %p31_p7 = scmp.eq.s32.totalorder %s30_s22, 0 }
   0xe   : > { %120 = sbr.rel (%p417_p8) target bundleno = 27 (0x1b), region = 16 }
   0xf   : > { %s635_s24 = scalar_select %p31_p7, %s542_s10, %s33_s23  }
  0x13   : > { %123 = sbr.rel (!%p42_p5) target bundleno = 27 (0x1b), region = 20  ;;  %s125_s25 = sand.u32 (%p42_p5), 1, %s542_s10  }
  0x14   : > { %s419_s26 = sshll.u32 (%p42_p5), %s558_s14, 3  ;;  %s418_s27 = sshll.u32 (%p42_p5), %s125_s25, 4 }
  0x15   : > { %s129_s28 = sadd.s32 (%p42_p5), %s554_s13, %s419_s26  ;;  %s127_s5 = scalar_lea.vmem (%p42_p5), [#allocation2], %s418_s27 }
  0x16   : > { %s420_s29 = sshll.u32 (%p42_p5), %s129_s28, 2 }
  0x17   : > { %s131_s4 = scalar_lea.vmem (%p42_p5), %s680_s0, %s420_s29 }
  0x18   : > { %v148_v0 = vld [vmem:[%s131_s4] sm:$0xf]  ;;  %v150_v1 = vld [vmem:[%s131_s4 + $0x8] sm:$0xf]  ;;  %v152_v2 = vld [vmem:[%s131_s4 + $0x10] sm:$0xf] }
  0x19   : > { %149 = vst [vmem:[%s127_s5] sm:$0xf] %v148_v0  ;;  %151 = vst [vmem:[%s127_s5 + $0x4] sm:$0xf] %v150_v1  ;;  %v154_v3 = vld [vmem:[%s131_s4 + $0x18] sm:$0xf] }
  0x1a   : > { %153 = vst [vmem:[%s127_s5 + $0x8] sm:$0xf] %v152_v2  ;;  %155 = vst [vmem:[%s127_s5 + $0xc] sm:$0xf] %v154_v3 }
  0x1b PF: > { %p421_p9 = scmp.ge.s32.totalorder %s562_s15, 1  ;;  %p193_p10 = scmp.lt.s32.totalorder %s562_s15, 5 }
  0x1d   : > { %p194_p11 = pnand %p421_p9, %p193_p10 }
  0x1e   : > { %s200_s6 = sand.u32 (!%p194_p11), 1, %s538_s9   ;;  %p224_p12 = scmp.lt.s32.totalorder (!%p194_p11), %s550_s12, 1 }
  0x1f   : > { %197 = sbr.rel (%p194_p11) target bundleno = 59 (0x3b), region = 65  ;;  %s422_s7 = sshll.u32 (!%p194_p11), %s200_s6, 4 }
  0x20   : > { %s202_s18 = scalar_lea.vmem (!%p194_p11), [#allocation2], %s422_s7  ;;  %s223_s9 = scalar_lea.vmem (!%p194_p11), [#allocation3], %s422_s7 }
  0x24   : > { %s225_s8 = scalar_select %p224_p12, %s550_s12, 1  ;;  %v433_v4 = vld [vmem:[%s202_s18] sm:$0xff]   ;;  %v450_v5 = vld [vmem:[%s202_s18 + $0x8] sm:$0xff]  }
  0x25   : > { %v434_v6 = vunpack.c.l.bf16 %v433_v4  ;;  %v435_v7 = vunpack.c.h.bf16 %v433_v4  ;;  %v438_v8 = vunpack.c.l.bf16 %v450_v5  ;;  %v439_v9 = vunpack.c.h.bf16 %v450_v5  ;;  %s428_s25 = sshll.u32 (%p627_p6), %s550_s12, 3 }
  0x26   : > { %s424_s19 = sshll.u32 %s225_s8, 1  ;;  %s274_s26 = sadd.s32 (%p627_p6), %s546_s11, %s428_s25 }
  0x27   : > { %s227_s23 = scalar_lea.vmem %s681_s1, %s424_s19  ;;  %s429_s27 = sshll.u32 (%p627_p6), %s274_s26, 2 }
  0x28   : > { %v425_v10 = vld [vmem:[%s227_s23] ss:$0 sm:$0xff]  ;;  %v426_v11 = vld [vmem:[%s227_s23 + $0x1] ss:$0 sm:$0xff]  ;;  %s276_s30 = scalar_lea.vmem (%p627_p6), %s682_s2, %s429_s27 }
  0x29   : > { %v242_v12 = vsub.f32 %v434_v6, %v425_v10  ;;  %v243_v13 = vsub.f32 %v435_v7, %v425_v10  ;;  %v244_v14 = vsub.f32 %v438_v8, %v425_v10  ;;  %v245_v15 = vsub.f32 %v439_v9, %v425_v10 }
  0x2b   : > { %v250_v16 = vmul.f32 %v426_v11, %v242_v12  ;;  %v251_v17 = vmul.f32 %v426_v11, %v243_v13  ;;  %v252_v18 = vmul.f32 %v426_v11, %v244_v14  ;;  %v253_v19 = vmul.f32 %v426_v11, %v245_v15 }
  0x2d   : > { %v254_v20 = vmax.f32 %v250_v16, 0.0  ;;  %v255_v21 = vmax.f32 %v251_v17, 0.0  ;;  %v256_v22 = vmax.f32 %v252_v18, 0.0  ;;  %v257_v23 = vmax.f32 %v253_v19, 0.0  ;;  %272 = sbr.rel (!%p627_p6) target bundleno = 59 (0x3b), region = 73 }
  0x2f   : > { %v443_v24 = vpack.c.bf16 %v255_v21, %v254_v20  ;;  %v448_v25 = vpack.c.bf16 %v257_v23, %v256_v22 }
  0x31   : > { %444 = vst [vmem:[%s223_s9] sm:$0xff] %v443_v24   ;;  %451 = vst [vmem:[%s223_s9 + $0x8] sm:$0xff] %v448_v25  }
  0x38   : > { %v293_v26 = vld [vmem:[%s223_s9] sm:$0xf]  ;;  %v295_v27 = vld [vmem:[%s223_s9 + $0x4] sm:$0xf]  ;;  %v297_v28 = vld [vmem:[%s223_s9 + $0x8] sm:$0xf] }
  0x39   : > { %v299_v29 = vld [vmem:[%s223_s9 + $0xc] sm:$0xf]  ;;  %294 = vst [vmem:[%s276_s30] sm:$0xf] %v293_v26  ;;  %296 = vst [vmem:[%s276_s30 + $0x8] sm:$0xf] %v295_v27 }
  0x3a   : > { %298 = vst [vmem:[%s276_s30 + $0x10] sm:$0xf] %v297_v28  ;;  %300 = vst [vmem:[%s276_s30 + $0x18] sm:$0xf] %v299_v29 }
  0x3b PF: > { %s12_s15 = sadd.s32 1, %s562_s15   ;;  %s684_s9 = smov %s542_s10 }
  0x3c   : > { %p9_p13 = scmp.ge.s32.totalorder %s12_s15, 6   ;;  %s685_s10 = smov %s635_s24 }
  0x3d   : > { %s686_s11 = smov %s554_s13  ;;  %s687_s12 = smov %s558_s14 }
  0x3e   : > { %s688_s13 = smov %s691_s16  ;;  %s689_s14 = smov %s695_s17 }
  0x3f   :  { %11 = sbr.rel (!%p9_p13) target bundleno = 4 (0x4), region = 148 }

// kernel: up_forward.2
= control target key start
LH: loop header
LB: loop body
LE: loop exit
PB: predicated region body
PF: predicated region fallthrough
CT: control target
= control target key end

     0   :  { %s3877_s15 = smov 0   ;;  %s3879_s16 = smov 0   ;;  %s5200_s0 = inlined_call_operand.vmem [shape: bf16[2,17,17,4], index: 0, kind: input, shape index: {}, may-alias: {0,1}]   ;;  %s5201_s1 = inlined_call_operand.vmem [shape: bf16[2,17,17,4], index: 1, kind: input, shape index: {}, may-alias: {0,1}]   ;;  %s5202_s2 = inlined_call_operand.vmem [shape: bf16[9,4,8], index: 2, kind: input, shape index: {}]   ;;  %s5203_s3 = inlined_call_operand.vmem [shape: bf16[2,4,16,16,8], index: 3, kind: output, shape index: {0}]   ;;  %s5204_s4 = inlined_call_operand.vmem [shape: f32[2,2,2,8], index: 4, kind: output, shape index: {1}]  }
   0x1   :  { %s3881_s17 = smov 0   ;;  %s3883_s18 = smov 0  }
   0x2   :  { %s3885_s19 = smov 0   ;;  %s3887_s20 = smov 0  }
   0x3   :  { %s3889_s21 = smov 0  }
   0x4 LB: > { %s24_s22 = sadd.s32 1, %s3842_s19  ;;  %s27_s23 = sadd.s32 1, %s3846_s20  ;;  %s3850_s21 = sphi %s3889_s21, %s15_s21   ;;  %s3846_s20 = sphi %s3887_s20, %s5229_s20   ;;  %s3842_s19 = sphi %s3885_s19, %s5228_s19   ;;  %s3838_s18 = sphi %s3883_s18, %s5227_s18   ;;  %s3834_s17 = sphi %s3881_s17, %s5226_s17   ;;  %s3830_s16 = sphi %s3879_s16, %s5225_s16   ;;  %s3826_s15 = sphi %s3877_s15, %s5224_s15  }
   0x5   : > { %p25_p0 = scmp.ge.s32.totalorder %s24_s22, 2  ;;  %s3128_s24 = sadd.s32 4294967295, %s3850_s21  }
   0x6   : > { %p127_p1 = scmp.ne.s32.totalorder %s3830_s16, %s3826_s15  ;;  %p128_p2 = scmp.eq.s32.totalorder %s3128_s24, 3 }
   0x7   : > { %s5231_s22 = smov (%p25_p0, %s24_s22), 0  ;;  %s5233_s23 = smov (!%p25_p0, %s27_s23), %s3846_s20 }
   0x8   : > { %s113_s25 = ssub.s32 %s3842_s19, %s5231_s22  ;;  %p29_p3 = scmp.ge.s32.totalorder %s5233_s23, 2 }
   0x9   : > { %p3134_p4 = scmp.ge.s32.totalorder %s3850_s21, 1  ;;  %p3923_p5 = por %p128_p2, %p127_p1 }
   0xa   : > { %p223_p6 = scmp.lt.s32.totalorder %s3850_s21, 5  ;;  %s5235_s23 = smov (%p29_p3, %s5233_s23), 0 }
   0xb   : > { %s112_s27 = ssub.s32 %s3846_s20, %s5235_s23  ;;  %s117_s29 = sadd.s32 1, %s3830_s16 }
   0xc   : > { %p224_p7 = pnand %p3134_p4, %p223_p6  ;;  %s114_s28 = sor.u32 %s113_s25, %s112_s27 }
   0xd   : > { %p115_p8 = scmp.eq.s32.totalorder %s114_s28, 0 }
   0xe   : > { %227 = sbr.rel (%p224_p7) target bundleno = 415 (0x19f), region = 32 }
   0xf   : > { %s3934_s30 = scalar_select %p115_p8, %s3830_s16, %s117_s29  }
  0x13   : > { %v3179_v0 = vld [vmem:[%s5202_s2 + $0x8] sm:$0x3]  ;;  %vm877_vm0 = vcmask 1041408   ;;  %s3940_s7 = sshll.u32 %s3834_s17, 3  ;;  %p283_p9 = scmp.lt.s32.totalorder %s3838_s18, 1  ;;  %vm852_vm1 = vcmask 31744  }
  0x14   : > { %3711 = vmatprep.subr.msk.bf16.mxu1 %vm877_vm0, %v3179_v0  ;;  %3710 = vmatprep.subr.msk.bf16.mxu0 %vm877_vm0, %v3179_v0  ;;  %v879_v1 = vsel %vm877_vm0, %v3179_v0, 0  ;;  %p285_p10 = scmp.lt.s32.totalorder %s3940_s7, 16  ;;  %v3213_v2 = vld [vmem:[%s5202_s2 + $0xa] sm:$0x3]  ;;  %v3212_v3 = vld [vmem:[%s5202_s2 + $0x6] sm:$0x3] }
  0x15   : > { %3709 = vmatpush3.bf16.msra.mxu1 %v879_v1  ;;  %3547 = vmatpush3.bf16.msra.mxu0 %v879_v1  ;;  %s3951_s10 = scalar_select %p283_p9, %s3838_s18, 1  ;;  %v3963_v4 = vld [vmem:[%s5202_s2 + $0xe] sm:$0x3]  ;;  %v3968_v5 = vld [vmem:[%s5202_s2 + $0x2] sm:$0x3]  ;;  %v3978_v6 = vsel %vm877_vm0, %v3213_v2, 0 }
  0x16   : > { %s286_s13 = scalar_select %p285_p10, %s3940_s7, 16  ;;  %3712 = vmatprep.subr.msk.bf16.mxu1 %vm877_vm0, %v3213_v2  ;;  %3713 = vmatprep.subr.msk.bf16.mxu0 %vm877_vm0, %v3212_v3  ;;  %vm345_vm2 = vsmask.f32 3328  ;;  %vm346_vm3 = vsmask.f32 7440  ;;  %v1321_v7 = vsel %vm877_vm0, %v3212_v3, 0 }
  0x17   : > { %s3721_s14 = smul.u32 51, %s3951_s10  ;;  %v3983_v8 = vsel %vm877_vm0, %v3963_v4, 0  ;;  %v3987_v9 = vsel %vm877_vm0, %v3968_v5, 0  ;;  %s3399_s12 = sadd.s32 8, %s3940_s7  ;;  %vm4044_vm4 = vmor %vm345_vm2, %vm346_vm3  ;;  %vm797_vm5 = vsmask.f32 7424 }
  0x18   : > { %s3720_s24 = smul.u32 3, %s286_s13  ;;  %p4028_p11 = scmp.lt.s32.totalorder %s3399_s12, 16  ;;  %vm1042_vm6 = vcmask 60416   ;;  %vm1075_vm7 = vcmask 64512   ;;  %vm2677_vm8 = vcmask 57344  }
  0x19   : > { %p314_p12 = scmp.lt.s32.totalorder %s3834_s17, 1  ;;  %s3140_s25 = sshll.u32 %s3951_s10, 1 }
  0x1a   : > { %s289_s5 = sadd.s32 %s3721_s14, %s3720_s24  ;;  %s5237_s12 = smov (!%p4028_p11, %s3399_s12), 16 }
  0x1b   : > { %s3137_s6 = sshll.u32 %s289_s5, 2  ;;  %s3722_s7 = smul.u32 3, %s5237_s12 }
  0x1c   : > { %s3975_s11 = scalar_lea.vmem %s5200_s0, %s3137_s6  ;;  %s3464_s10 = sshll.u32 (%p3923_p5), %s3834_s17, 4 }
  0x1d   : > { %v321_v10 = vld [vmem:[%s3975_s11] sm:$0xf]  ;;  %v322_v11 = vld [vmem:[%s3975_s11 + $0x4] sm:$0xf]  ;;  %v329_v12 = vld [vmem:[%s3975_s11 + $0x30] sm:$0xf]  ;;  %s4131_s24 = sadd.s32 %s3722_s7, %s3721_s14 }
  0x1e   : > { %v349_v13 = vshrl.u32 %v321_v10, 16  ;;  %v352_v14 = vshll.u32 %v321_v10, 16  ;;  %v358_v15 = vshll.u32 %v322_v11, 16  ;;  %v362_v16 = vshrl.u32 %v322_v11, 16  ;;  %v330_v17 = vld [vmem:[%s3975_s11 + $0x34] sm:$0xf] }
  0x1f   : > { %v3993_v18 = vcombine.low %v321_v10, %v322_v11  ;;  %v445_v19 = vshrl.u32 %v329_v12, 16  ;;  %v448_v20 = vshll.u32 %v329_v12, 16  ;;  %v454_v21 = vshll.u32 %v330_v17, 16  ;;  %v323_v22 = vld [vmem:[%s3975_s11 + $0xc] sm:$0xf]  ;;  %s3139_s14 = sshll.u32 %s4131_s24, 2 }
  0x20   : > { %v3996_v23 = vrot.slane %v349_v13, 4  ;;  %v3998_v24 = vrot.slane %v352_v14, 5  ;;  %v4000_v25 = vrot.slane %v358_v15, 5  ;;  %v4002_v26 = vrot.slane %v362_v16, 4  ;;  %v324_v27 = vld [vmem:[%s3975_s11 + $0x10] sm:$0xf]  ;;  %s4183_s5 = scalar_lea.vmem %s5201_s1, %s3139_s14 }
  0x21   : > { %3548 = vmatprep.mubr.msk.bf16.mxu0 %vm852_vm1, %v3993_v18  ;;  %v4007_v28 = vrot.slane %v445_v19, 4  ;;  %v4009_v29 = vrot.slane %v448_v20, 5  ;;  %v4011_v30 = vrot.slane %v454_v21, 5  ;;  %v458_v31 = vshrl.u32 %v330_v17, 16  ;;  %v331_v36 = vld [vmem:[%s3975_s11 + $0x3c] sm:$0xf] }
  0x22   : > { %v4014_v32 = vcombine.low %v329_v12, %v330_v17  ;;  %v373_v33 = vshrl.u32 %v323_v22, 16  ;;  %v376_v34 = vshll.u32 %v323_v22, 16  ;;  %v382_v35 = vshll.u32 %v324_v27, 16  ;;  %v332_v40 = vld [vmem:[%s3975_s11 + $0x40] sm:$0xf]  ;;  %s3390_s8 = sshll.u32 (%p3923_p5), %s3838_s18, 7 }
  0x23   : > { %v4017_v37 = vrot.slane %v458_v31, 4  ;;  %v386_v38 = vshrl.u32 %v324_v27, 16  ;;  %v4019_v39 = vcombine.low %v323_v22, %v324_v27  ;;  %v469_v41 = vshrl.u32 %v331_v36, 16  ;;  %v325_v50 = vld [vmem:[%s3975_s11 + $0x18] sm:$0xf]  ;;  %v3794_v56 = vld [vmem:[%s4183_s5] sm:$0xff]   ;;  %s2698_s26 = sadd.s32 (%p3923_p5), %s3464_s10, %s3390_s8 }
  0x24   : > { %3556 = vmatprep.mubr.msk.bf16.mxu1 %vm852_vm1, %v4014_v32  ;;  %v375_v42 = vrot.slane %v373_v33, 4  ;;  %v378_v43 = vrot.slane %v376_v34, 5  ;;  %v4024_v44 = vrot.slane %v382_v35, 5  ;;  %v472_v45 = vshll.u32 %v331_v36, 16  ;;  %v326_v54 = vld [vmem:[%s3975_s11 + $0x1c] sm:$0xf] }
  0x25   : > { %v388_v46 = vrot.slane %v386_v38, 4  ;;  %3549 = vmatmul.mubr.msk.bf16.vlgmr.msra.gmra.mxu0 %vm852_vm1, %v4019_v39  ;;  %v4034_v47 = vrot.slane %v469_v41, 4  ;;  %v478_v48 = vshll.u32 %v332_v40, 16  ;;  %v482_v49 = vshrl.u32 %v332_v40, 16  ;;  %v333_v61 = vld [vmem:[%s3975_s11 + $0x48] sm:$0xf] }
  0x26   : > { %v379_v51 = vor.u32 %v378_v43, %v375_v42  ;;  %v4037_v52 = vrot.slane %v472_v45, 5  ;;  %v4039_v53 = vcombine.low %v331_v36, %v332_v40  ;;  %3583 = vmatpush3.bf16.msra.mxu0 %v1321_v7  ;;  %v397_v55 = vshrl.u32 %v325_v50, 16  ;;  %v334_v2 = vld [vmem:[%s3975_s11 + $0x4c] sm:$0xf]  ;;  %v335_v33 = vld [vmem:[%s3975_s11 + $0x54] sm:$0xf] }
  0x27   : > { %v389_v57 = vor.u32 %v388_v46, %v4024_v44  ;;  %v4049_v58 = vrot.slane %v478_v48, 5  ;;  %v4051_v59 = vrot.slane %v482_v49, 4  ;;  %v400_v60 = vshll.u32 %v325_v50, 16  ;;  %3715 = vmatprep.subr.msk.bf16.mxu0 %vm877_vm0, %v3968_v5  ;;  %v327_v5 = vld [vmem:[%s3975_s11 + $0x24] sm:$0xf]  ;;  %s3391_s9 = sshll.u32 (%p3923_p5), %s2698_s26, 2 }
  0x28   : > { %v4056_v62 = vrot.slane %v379_v51, 4  ;;  %3557 = vmatmul.mubr.msk.bf16.vlgmr.msra.gmra.mxu1 %vm852_vm1, %v4039_v53  ;;  %v4060_v63 = vrot.slane %v397_v55, 4  ;;  %v406_v0 = vshll.u32 %v326_v54, 16  ;;  %v410_v1 = vshrl.u32 %v326_v54, 16  ;;  %v336_v38 = vld [vmem:[%s3975_s11 + $0x58] sm:$0xf]  ;;  %s5122_s7 = scalar_lea.vmem (%p3923_p5), %s5203_s3, %s3391_s9 }
  0x29   : > { %v4063_v3 = vrot.slane %v389_v57, 4  ;;  %3565 = vmatpush3.bf16.msra.mxu1 %v3978_v6  ;;  %v402_v7 = vrot.slane %v400_v60, 5  ;;  %v4066_v10 = vcombine.low %v325_v50, %v326_v54  ;;  %v493_v11 = vshrl.u32 %v333_v61, 16  ;;  %v328_v6 = vld [vmem:[%s3975_s11 + $0x28] sm:$0xf] }
  0x2a   : > { %v385_v12 = vsel %vm4044_vm4, %v4056_v62, %v4024_v44  ;;  %v4079_v13 = vrot.slane %v406_v0, 5  ;;  %v412_v14 = vrot.slane %v410_v1, 4  ;;  %v496_v15 = vshll.u32 %v333_v61, 16  ;;  %3714 = vmatprep.subr.msk.bf16.mxu1 %vm877_vm0, %v3963_v4  ;;  %v337_v45 = vld [vmem:[%s3975_s11 + $0x8] sm:$0x1] }
  0x2b   : > { %3552 = vmatprep.mubr.msk.bf16.mxu0 %vm852_vm1, %v4066_v10  ;;  %v4086_v16 = vrot.slane %v493_v11, 4  ;;  %v502_v17 = vshll.u32 %v334_v2, 16  ;;  %v506_v19 = vshrl.u32 %v334_v2, 16  ;;  %v4088_v20 = vcombine.low %v333_v61, %v334_v2  ;;  %v338_v51 = vld [vmem:[%s3975_s11 + $0x14] sm:$0x1] }
  0x2c   : > { %v4090_v21 = vrot.slane %v496_v15, 5  ;;  %v421_v22 = vshrl.u32 %v327_v5, 16  ;;  %v424_v27 = vshll.u32 %v327_v5, 16  ;;  %v430_v31 = vshll.u32 %v328_v6, 16  ;;  %v339_v61 = vld [vmem:[%s3975_s11 + $0x20] sm:$0x1] }
  0x2d   : > { %v4093_v34 = vrot.slane %v502_v17, 5  ;;  %v4095_v4 = vrot.slane %v506_v19, 4  ;;  %3560 = vmatprep.mubr.msk.bf16.mxu1 %vm852_vm1, %v4088_v20  ;;  %v434_v35 = vshrl.u32 %v328_v6, 16  ;;  %v4099_v36 = vcombine.low %v327_v5, %v328_v6 }
  0x2e   : > { %v423_v40 = vrot.slane %v421_v22, 4  ;;  %v426_v41 = vrot.slane %v424_v27, 5  ;;  %v4103_v42 = vrot.slane %v430_v31, 5  ;;  %v517_v43 = vshrl.u32 %v335_v33, 16 }
  0x2f   : > { %v436_v46 = vrot.slane %v434_v35, 4  ;;  %3553 = vmatmul.mubr.msk.bf16.gmra.mxu0 %vm852_vm1, %v4099_v36  ;;  %v520_v48 = vshll.u32 %v335_v33, 16  ;;  %v526_v49 = vshll.u32 %v336_v38, 16  ;;  %v530_v50 = vshrl.u32 %v336_v38, 16 }
  0x30   : > { %v4109_v54 = vrot.slane %v517_v43, 4  ;;  %v4111_v55 = vcombine.low %v335_v33, %v336_v38  ;;  %v355_v57 = vor.u32 %v3998_v24, %v3996_v23  ;;  %v365_v60 = vor.u32 %v4002_v26, %v4000_v25  ;;  %3584 = vmatprep.mubr.msk.bf16.mxu0 %vm852_vm1, %v3993_v18  ;;  %v340_v33 = vld [vmem:[%s3975_s11 + $0x2c] sm:$0x1] }
  0x31   : > { %v4120_v0 = vrot.slane %v520_v48, 5  ;;  %v4122_v1 = vrot.slane %v526_v49, 5  ;;  %v4124_v2 = vrot.slane %v530_v50, 4  ;;  %v368_v11 = vshll.u32 %v337_v45, 16  ;;  %v341_v45 = vld [vmem:[%s3975_s11 + $0x38] sm:$0x1] }
  0x32   : > { %3561 = vmatmul.mubr.msk.bf16.gmra.mxu1 %vm852_vm1, %v4111_v55  ;;  %v356_v5 = vrot.slane %v355_v57, 4  ;;  %v366_v23 = vrot.slane %v365_v60, 4  ;;  %v392_v24 = vshll.u32 %v338_v51, 16  ;;  %v403_v26 = vor.u32 %v402_v7, %v4060_v63  ;;  %v4155_v48 = vld [vmem:[%s5202_s2] sm:$0x3] }
  0x33   : > { %v370_v15 = vrot.slane %v368_v11, 5  ;;  %v413_v6 = vor.u32 %v412_v14, %v4079_v13  ;;  %v416_v17 = vshll.u32 %v339_v61, 16  ;;  %v427_v19 = vor.u32 %v426_v41, %v423_v40 }
  0x34   : > { %v361_v22 = vsel %vm4044_vm4, %v356_v5, %v4000_v25  ;;  %v394_v27 = vrot.slane %v392_v24, 5  ;;  %v404_v31 = vrot.slane %v403_v26, 4  ;;  %v437_v35 = vor.u32 %v436_v46, %v4103_v42  ;;  %v342_v46 = vld [vmem:[%s3975_s11 + $0x44] sm:$0x1] }
  0x35   : > { %v371_v63 = vsel %vm4044_vm4, %v366_v23, %v370_v15  ;;  %v414_v7 = vrot.slane %v413_v6, 4  ;;  %v418_v38 = vrot.slane %v416_v17, 5  ;;  %v428_v43 = vrot.slane %v427_v19, 4  ;;  %v343_v23 = vld [vmem:[%s3975_s11 + $0x50] sm:$0x1] }
  0x36   : > { %v4143_v14 = vcombine.low %v361_v22, %v371_v63  ;;  %v395_v40 = vsel %vm4044_vm4, %v4063_v3, %v394_v27  ;;  %v409_v25 = vsel %vm4044_vm4, %v404_v31, %v4079_v13  ;;  %v438_v41 = vrot.slane %v437_v35, 4  ;;  %v3143_v63 = vld [vmem:[%s3975_s11 + $0x10] sm:$0xf] }
  0x37   : > { %v4162_v49 = vcombine.low %v385_v12, %v395_v40  ;;  %3585 = vmatmul.mubr.msk.bf16.vlgmr.msra.gmra.mxu0 %vm852_vm1, %v4019_v39  ;;  %v419_v3 = vsel %vm4044_vm4, %v414_v7, %v418_v38  ;;  %v433_v13 = vsel %vm4044_vm4, %v428_v43, %v4103_v42  ;;  %v440_v50 = vshll.u32 %v340_v33, 16 }
  0x38   : > { %3566 = vmatprep.mubr.msk.bf16.mxu1 %vm852_vm1, %v4143_v14  ;;  %3619 = vmatpush3.bf16.msra.mxu0 %v3987_v9  ;;  %v4174_v51 = vcombine.low %v409_v25, %v419_v3  ;;  %v451_v44 = vor.u32 %v4009_v29, %v4007_v28  ;;  %v461_v62 = vor.u32 %v4017_v37, %v4011_v30  ;;  %v464_v12 = vshll.u32 %v341_v45, 16  ;;  %v3320_v37 = vld [vmem:[%s5202_s2 + $0x4] sm:$0x3] }
  0x39   : > { %3588 = vmatprep.mubr.msk.bf16.mxu0 %vm852_vm1, %v4066_v10  ;;  %v442_v42 = vrot.slane %v440_v50, 5  ;;  %v475_v9 = vor.u32 %v4037_v52, %v4034_v47  ;;  %v485_v28 = vor.u32 %v4051_v59, %v4049_v58  ;;  %v488_v29 = vshll.u32 %v342_v46, 16  ;;  %3717 = vmatprep.subr.msk.bf16.mxu0 %vm877_vm0, %v4155_v48  ;;  %v3144_v46 = vld [vmem:[%s3975_s11 + $0x18] sm:$0xf] }
  0x3a   : > { %3567 = vmatmul.mubr.msk.bf16.vlgmr.msra.gmra.mxu1 %vm852_vm1, %v4162_v49  ;;  %v452_v57 = vrot.slane %v451_v44, 4  ;;  %v462_v60 = vrot.slane %v461_v62, 4  ;;  %v466_v61 = vrot.slane %v464_v12, 5  ;;  %v499_v47 = vor.u32 %v4090_v21, %v4086_v16  ;;  %v3145_v12 = vld [vmem:[%s3975_s11 + $0x1c] sm:$0xf] }
  0x3b   : > { %3601 = vmatpush3.bf16.msra.mxu1 %v3983_v8  ;;  %3570 = vmatprep.mubr.msk.bf16.mxu1 %vm852_vm1, %v4174_v51  ;;  %v443_v52 = vsel %vm4044_vm4, %v438_v41, %v442_v42  ;;  %v476_v59 = vrot.slane %v475_v9, 4  ;;  %v486_v11 = vrot.slane %v485_v28, 4  ;;  %v490_v5 = vrot.slane %v488_v29, 5  ;;  %v344_v8 = vld [vmem:[%s3975_s11 + $0x5c] sm:$0x1] }
  0x3c   : > { %v457_v24 = vsel %vm4044_vm4, %v452_v57, %v4011_v30  ;;  %v467_v26 = vsel %vm4044_vm4, %v462_v60, %v466_v61  ;;  %v500_v16 = vrot.slane %v499_v47, 4  ;;  %3716 = vmatprep.subr.msk.bf16.mxu1 %vm877_vm0, %v3320_v37  ;;  %v4213_v21 = vcombine.low %v433_v13, %v443_v52  ;;  %v3146_v42 = vld [vmem:[%s3975_s11 + $0x24] sm:$0xf] }
  0x3d   : > { %v4215_v15 = vcombine.low %v457_v24, %v467_v26  ;;  %v509_v6 = vor.u32 %v4095_v4, %v4093_v34  ;;  %v4220_v17 = vsel %vm877_vm0, %v3320_v37, 0  ;;  %v481_v30 = vsel %vm4044_vm4, %v476_v59, %v4049_v58  ;;  %v3142_v58 = vld [vmem:[%s3975_s11 + $0xc] sm:$0xf]  ;;  %v3147_v37 = vld [vmem:[%s3975_s11 + $0x28] sm:$0xf] }
  0x3e   : > { %5214 = vst [vmem:[#allocation3_spill] sm:$0xff] %v4213_v21  ;;  %v491_v19 = vsel %vm4044_vm4, %v486_v11, %v490_v5  ;;  %v512_v22 = vshll.u32 %v343_v23, 16  ;;  %v523_v27 = vor.u32 %v4120_v0, %v4109_v54  ;;  %v505_v4 = vsel %vm4044_vm4, %v500_v16, %v4093_v34  ;;  %v3148_v5 = vld [vmem:[%s3975_s11 + $0x30] sm:$0xf] }
  0x3f   : > { %5215 = vst [vmem:[#allocation4_spill] sm:$0xff] %v4215_v15  ;;  %3589 = vmatmul.mubr.msk.bf16.gmra.mxu0 %vm852_vm1, %v4099_v36  ;;  %v510_v31 = vrot.slane %v509_v6, 4  ;;  %v533_v33 = vor.u32 %v4124_v2, %v4122_v1  ;;  %v536_v35 = vshll.u32 %v344_v8, 16  ;;  %v606_v0 = vshrl.u32 %v3142_v58, 16  ;;  %v3149_v8 = vld [vmem:[%s3975_s11 + $0x34] sm:$0xf] }
  0x40   : > { %3592 = vmatprep.mubr.msk.bf16.mxu0 %vm852_vm1, %v4014_v32  ;;  %v514_v7 = vrot.slane %v512_v22, 5  ;;  %v524_v54 = vrot.slane %v523_v27, 4  ;;  %v609_v38 = vshll.u32 %v3142_v58, 16  ;;  %v615_v34 = vshll.u32 %v3143_v63, 16 }
  0x41   : > { %v534_v43 = vrot.slane %v533_v33, 4  ;;  %v538_v45 = vrot.slane %v536_v35, 5  ;;  %v619_v40 = vshrl.u32 %v3143_v63, 16  ;;  %v4242_v2 = vcombine.low %v481_v30, %v491_v19  ;;  %v4298_v35 = vld [vmem:[%s3975_s11 + $0x3c] sm:$0xf] }
  0x42   : > { %3571 = vmatmul.mubr.msk.bf16.gmra.mxu1 %vm852_vm1, %v4213_v21  ;;  %v515_v25 = vsel %vm4044_vm4, %v510_v31, %v514_v7  ;;  %v4246_v41 = vcombine.low %v3142_v58, %v3143_v63  ;;  %v4251_v3 = vsel %vm877_vm0, %v4155_v48, 0  ;;  %v529_v13 = vsel %vm4044_vm4, %v524_v54, %v4122_v1  ;;  %v4307_v7 = vld [vmem:[%s3975_s11 + $0x40] sm:$0xf] }
  0x43   : > { %5216 = vst [vmem:[#allocation5_spill] sm:$0xff] %v4242_v2  ;;  %3574 = vmatprep.mubr.msk.bf16.mxu1 %vm852_vm1, %v4215_v15  ;;  %v539_v50 = vsel %vm4044_vm4, %v534_v43, %v538_v45  ;;  %v4260_v44 = vrot.slane %v606_v0, 4  ;;  %v4262_v62 = vrot.slane %v609_v38, 5  ;;  %v4266_v9 = vcombine.low %v505_v4, %v515_v25  ;;  %v3166_v15 = vld [vmem:[%s3975_s11 + $0x2c] sm:$0x1] }
  0x44   : > { %v4268_v48 = vrot.slane %v615_v34, 5  ;;  %v630_v28 = vshrl.u32 %v3144_v46, 16  ;;  %v633_v29 = vshll.u32 %v3144_v46, 16  ;;  %v4271_v57 = vrot.slane %v619_v40, 4  ;;  %v4319_v40 = vld [vmem:[%s3975_s11 + $0x48] sm:$0xf] }
  0x45   : > { %5217 = vst [vmem:[#allocation6_spill] sm:$0xff] %v4266_v9  ;;  %v639_v1 = vshll.u32 %v3145_v12, 16  ;;  %v643_v60 = vshrl.u32 %v3145_v12, 16  ;;  %v654_v61 = vshrl.u32 %v3146_v42, 16  ;;  %v4273_v47 = vcombine.low %v529_v13, %v539_v50 }
  0x46   : > { %v4275_v52 = vcombine.low %v3144_v46, %v3145_v12  ;;  %v657_v59 = vshll.u32 %v3146_v42, 16  ;;  %v663_v11 = vshll.u32 %v3147_v37, 16  ;;  %v4280_v23 = vrot.slane %v630_v28, 4  ;;  %v4329_v12 = vld [vmem:[%s3975_s11 + $0x4c] sm:$0xf] }
  0x47   : > { %5218 = vst [vmem:[#allocation7_spill] sm:$0xff] %v4273_v47  ;;  %3593 = vmatmul.mubr.msk.bf16.gmra.mxu0 %vm852_vm1, %v4039_v53  ;;  %v4282_v24 = vrot.slane %v633_v29, 5  ;;  %v4284_v26 = vcombine.low %v3146_v42, %v3147_v37  ;;  %v667_v16 = vshrl.u32 %v3147_v37, 16  ;;  %v4289_v6 = vrot.slane %v639_v1, 5  ;;  %v4337_v1 = vld [vmem:[%s3975_s11 + $0x54] sm:$0xf] }
  0x48   : > { %3596 = vmatprep.mubr.msk.bf16.mxu0 %vm852_vm1, %v4088_v20  ;;  %v4291_v30 = vrot.slane %v643_v60, 4  ;;  %v4293_v19 = vrot.slane %v654_v61, 4  ;;  %v678_v22 = vshrl.u32 %v3148_v5, 16  ;;  %v4295_v27 = vrot.slane %v657_v59, 5 }
  0x49   : > { %v681_v4 = vshll.u32 %v3148_v5, 16  ;;  %v687_v31 = vshll.u32 %v3149_v8, 16  ;;  %v691_v33 = vshrl.u32 %v3149_v8, 16  ;;  %v4302_v58 = vrot.slane %v663_v11, 5 }
  0x4a   : > { %3575 = vmatmul.mubr.msk.bf16.gmra.mxu1 %vm852_vm1, %v4242_v2  ;;  %v4304_v63 = vcombine.low %v3148_v5, %v3149_v8  ;;  %v702_v54 = vshrl.u32 %v4298_v35, 16  ;;  %v705_v0 = vshll.u32 %v4298_v35, 16  ;;  %v669_v38 = vrot.slane %v667_v16, 4  ;;  %v3164_v5 = vld [vmem:[%s3975_s11 + $0x14] sm:$0x1] }
  0x4b   : > { %3578 = vmatprep.mubr.msk.bf16.mxu1 %vm852_vm1, %v4266_v9  ;;  %v4313_v43 = vrot.slane %v678_v22, 4  ;;  %v4315_v45 = vrot.slane %v681_v4, 5  ;;  %v711_v34 = vshll.u32 %v4307_v7, 16  ;;  %v4321_v25 = vrot.slane %v687_v31, 5  ;;  %v4355_v4 = vld [vmem:[%s3975_s11 + $0x58] sm:$0xf] }
  0x4c   : > { %v4323_v46 = vrot.slane %v691_v33, 4  ;;  %v4325_v13 = vrot.slane %v702_v54, 4  ;;  %v715_v50 = vshrl.u32 %v4307_v7, 16  ;;  %v4331_v42 = vrot.slane %v705_v0, 5 }
  0x4d   : > { %v726_v28 = vshrl.u32 %v4319_v40, 16  ;;  %v729_v29 = vshll.u32 %v4319_v40, 16  ;;  %v735_v37 = vshll.u32 %v4329_v12, 16  ;;  %v4339_v60 = vrot.slane %v711_v34, 5 }
  0x4e   : > { %v4341_v61 = vrot.slane %v715_v50, 4  ;;  %v739_v59 = vshrl.u32 %v4329_v12, 16  ;;  %v750_v11 = vshrl.u32 %v4337_v1, 16  ;;  %v753_v31 = vshll.u32 %v4337_v1, 16  ;;  %v3165_v50 = vld [vmem:[%s3975_s11 + $0x20] sm:$0x1] }
  0x4f   : > { %3597 = vmatmul.mubr.msk.bf16.gmra.mxu0 %vm852_vm1, %v4111_v55  ;;  %v4348_v16 = vrot.slane %v726_v28, 4  ;;  %v4350_v8 = vrot.slane %v729_v29, 5  ;;  %v4352_v22 = vrot.slane %v735_v37, 5  ;;  %v759_v0 = vshll.u32 %v4355_v4, 16 }
  0x50   : > { %3620 = vmatprep.mubr.msk.bf16.mxu0 %vm852_vm1, %v3993_v18  ;;  %v4360_v33 = vrot.slane %v739_v59, 4  ;;  %v4362_v54 = vrot.slane %v750_v11, 4  ;;  %v763_v34 = vshrl.u32 %v4355_v4, 16  ;;  %v4367_v28 = vrot.slane %v753_v31, 5 }
  0x51   : > { %v612_v29 = vor.u32 %v4262_v62, %v4260_v44  ;;  %v622_v37 = vor.u32 %v4271_v57, %v4268_v48  ;;  %v625_v9 = vshll.u32 %v3164_v5, 16  ;;  %v4375_v59 = vrot.slane %v759_v0, 5 }
  0x52   : > { %3579 = vmatmul.mubr.msk.bf16.gmra.mxu1 %vm852_vm1, %v4273_v47  ;;  %v4377_v11 = vrot.slane %v763_v34, 4  ;;  %v636_v2 = vor.u32 %v4282_v24, %v4280_v23  ;;  %v646_v31 = vor.u32 %v4291_v30, %v4289_v6  ;;  %v649_v5 = vshll.u32 %v3165_v50, 16 }
  0x53   : > { %3602 = vmatprep.mubr.msk.bf16.mxu1 %vm852_vm1, %v4246_v41  ;;  %v613_v44 = vrot.slane %v612_v29, 4  ;;  %v623_v62 = vrot.slane %v622_v37, 4  ;;  %v627_v57 = vrot.slane %v625_v9, 5  ;;  %v660_v34 = vor.u32 %v4295_v27, %v4293_v19  ;;  %v3167_v37 = vld [vmem:[%s3975_s11 + $0x38] sm:$0x1] }
  0x54   : > { %v637_v47 = vrot.slane %v636_v2, 4  ;;  %v647_v0 = vrot.slane %v646_v31, 4  ;;  %v670_v21 = vor.u32 %v669_v38, %v4302_v58  ;;  %v651_v30 = vrot.slane %v649_v5, 5  ;;  %v4398_v2 = vld [vmem:[%s5202_s2 + $0x10] sm:$0x3] }
  0x55   : > { %v618_v23 = vsel %vm4044_vm4, %v613_v44, %v4268_v48  ;;  %v628_v24 = vsel %vm4044_vm4, %v623_v62, %v627_v57  ;;  %v673_v29 = vshll.u32 %v3166_v15, 16  ;;  %v661_v27 = vrot.slane %v660_v34, 4  ;;  %v3168_v44 = vld [vmem:[%s3975_s11 + $0x44] sm:$0x1]  ;;  %v3169_v57 = vld [vmem:[%s3975_s11 + $0x50] sm:$0x1] }
  0x56   : > { %v4400_v9 = vcombine.low %v618_v23, %v628_v24  ;;  %v642_v19 = vsel %vm4044_vm4, %v637_v47, %v4289_v6  ;;  %v671_v38 = vrot.slane %v670_v21, 4  ;;  %v652_v15 = vsel %vm4044_vm4, %v647_v0, %v651_v30  ;;  %v3170_v30 = vld [vmem:[%s3975_s11 + $0x5c] sm:$0x1]  ;;  %s264_s11 = sand.u32 1, %s3826_s15  }
  0x57   : > { %3621 = vmatmul.mubr.msk.bf16.vlgmr.msra.gmra.mxu0 %vm852_vm1, %v4019_v39  ;;  %v675_v48 = vrot.slane %v673_v29, 5  ;;  %v684_v50 = vor.u32 %v4315_v45, %v4313_v43  ;;  %v694_v31 = vor.u32 %v4323_v46, %v4321_v25  ;;  %v4417_v21 = vcombine.low %v642_v19, %v652_v15  ;;  %v3337_v43 = vld [vmem:[%s5202_s2 + $0xc] sm:$0x3]  ;;  %s3135_s24 = sshll.u32 %s264_s11, 8 }
  0x58   : > { %3655 = vmatpush3.bf16.msra.mxu0 %v4251_v3  ;;  %3624 = vmatprep.mubr.msk.bf16.mxu0 %vm852_vm1, %v4066_v10  ;;  %v666_v47 = vsel %vm4044_vm4, %v661_v27, %v4302_v58  ;;  %v697_v6 = vshll.u32 %v3167_v37, 16  ;;  %v708_v62 = vor.u32 %v4331_v42, %v4325_v13  ;;  %v718_v58 = vor.u32 %v4341_v61, %v4339_v60  ;;  %s4554_s14 = scalar_lea.vmem [#allocation2], %s3135_s24 }
  0x59   : > { %3719 = vmatprep.subr.msk.bf16.mxu0 %vm877_vm0, %v4398_v2  ;;  %v676_v3 = vsel %vm4044_vm4, %v671_v38, %v675_v48  ;;  %v685_v45 = vrot.slane %v684_v50, 4  ;;  %v695_v46 = vrot.slane %v694_v31, 4  ;;  %v721_v0 = vshll.u32 %v3168_v44, 16  ;;  %s315_s15 = scalar_select %p314_p12, %s3834_s17, 1 }
  0x5a   : > { %3603 = vmatmul.mubr.msk.bf16.vlgmr.msra.gmra.mxu1 %vm852_vm1, %v4275_v52  ;;  %v4436_v13 = vcombine.low %v666_v47, %v676_v3  ;;  %v699_v42 = vrot.slane %v697_v6, 5  ;;  %v709_v5 = vrot.slane %v708_v62, 4  ;;  %v719_v23 = vrot.slane %v718_v58, 4 }
  0x5b   : > { %3637 = vmatpush3.bf16.msra.mxu1 %v4220_v17  ;;  %3606 = vmatprep.mubr.msk.bf16.mxu1 %vm852_vm1, %v4284_v26  ;;  %v690_v34 = vsel %vm4044_vm4, %v685_v45, %v4321_v25  ;;  %v732_v61 = vor.u32 %v4350_v8, %v4348_v16  ;;  %v742_v24 = vor.u32 %v4360_v33, %v4352_v22  ;;  %v723_v37 = vrot.slane %v721_v0, 5  ;;  %s317_s27 = sadd.s32 %s3140_s25, %s315_s15 }
  0x5c   : > { %3718 = vmatprep.subr.msk.bf16.mxu1 %vm877_vm0, %v3337_v43  ;;  %v700_v17 = vsel %vm4044_vm4, %v695_v46, %v699_v42  ;;  %v714_v29 = vsel %vm4044_vm4, %v709_v5, %v4339_v60  ;;  %v745_v19 = vshll.u32 %v3169_v57, 16  ;;  %v756_v16 = vor.u32 %v4367_v28, %v4362_v54  ;;  %s3141_s28 = sshll.u32 %s317_s27, 1 }
  0x5d   : > { %v3174_v25 = vcombine.low %v690_v34, %v700_v17  ;;  %v733_v27 = vrot.slane %v732_v61, 4  ;;  %v743_v38 = vrot.slane %v742_v24, 4  ;;  %v724_v8 = vsel %vm4044_vm4, %v719_v23, %v723_v37  ;;  %s319_s6 = scalar_lea.vmem %s5204_s4, %s3141_s28 }
  0x5e   : > { %v747_v33 = vrot.slane %v745_v19, 5  ;;  %v766_v15 = vor.u32 %v4377_v11, %v4375_v59  ;;  %v769_v48 = vshll.u32 %v3170_v30, 16  ;;  %v3160_v60 = vcombine.low %v4298_v35, %v4307_v7 }
  0x5f   : > { %3625 = vmatmul.mubr.msk.bf16.gmra.mxu0 %vm852_vm1, %v4099_v36  ;;  %v3175_v50 = vcombine.low %v714_v29, %v724_v8  ;;  %v738_v31 = vsel %vm4044_vm4, %v733_v27, %v4352_v22  ;;  %v757_v54 = vrot.slane %v756_v16, 4  ;;  %v3161_v6 = vcombine.low %v4319_v40, %v4329_v12 }
  0x60   : > { %3628 = vmatprep.mubr.msk.bf16.mxu0 %vm852_vm1, %v4014_v32  ;;  %v748_v28 = vsel %vm4044_vm4, %v743_v38, %v747_v33  ;;  %v767_v11 = vrot.slane %v766_v15, 4  ;;  %v771_v44 = vrot.slane %v769_v48, 5  ;;  %v3162_v62 = vcombine.low %v4337_v1, %v4355_v4 }
  0x61   : > { %v3176_v47 = vcombine.low %v738_v31, %v748_v28  ;;  %v762_v35 = vsel %vm4044_vm4, %v757_v54, %v4375_v59  ;;  %v2373_v40 = vsel %vm877_vm0, %v4398_v2, 0  ;;  %v2231_v12 = vsel %vm877_vm0, %v3337_v43, 0 }
  0x62   : > { %3607 = vmatmul.mubr.msk.bf16.gmra.mxu1 %vm852_vm1, %v4304_v63  ;;  %v772_v7 = vsel %vm4044_vm4, %v767_v11, %v771_v44 }
  0x63   : > { %3610 = vmatprep.mubr.msk.bf16.mxu1 %vm852_vm1, %v3160_v60  ;;  %v3177_v22 = vcombine.low %v762_v35, %v772_v7 }
  0x67   : > { %3629 = vmatmul.mubr.msk.bf16.gmra.mxu0 %vm852_vm1, %v4039_v53 }
  0x68   : > { %3632 = vmatprep.mubr.msk.bf16.mxu0 %vm852_vm1, %v4088_v20 }
  0x6a   : > { %3611 = vmatmul.mubr.msk.bf16.gmra.mxu1 %vm852_vm1, %v3161_v6 }
  0x6b   : > { %3614 = vmatprep.mubr.msk.bf16.mxu1 %vm852_vm1, %v3162_v62 }
  0x6f   : > { %3633 = vmatmul.mubr.msk.bf16.gmra.mxu0 %vm852_vm1, %v4111_v55 }
  0x70   : > { %3656 = vmatprep.mubr.msk.bf16.mxu0 %vm852_vm1, %v3993_v18  ;;  %v5219_v18 = vld [vmem:[#allocation3_spill] sm:$0xff] }
  0x72   : > { %3615 = vmatmul.mubr.msk.bf16.gmra.mxu1 %vm852_vm1, %v3794_v56 }
  0x73   : > { %3638 = vmatprep.mubr.msk.bf16.mxu1 %vm852_vm1, %v4143_v14 }
  0x77   : > { %3657 = vmatmul.mubr.msk.bf16.vlgmr.msra.gmra.mxu0 %vm852_vm1, %v4019_v39  ;;  %v5220_v39 = vld [vmem:[#allocation4_spill] sm:$0xff] }
  0x78   : > { %3691 = vmatpush3.bf16.msra.mxu0 %v2373_v40  ;;  %3660 = vmatprep.mubr.msk.bf16.mxu0 %vm852_vm1, %v4066_v10  ;;  %v5221_v10 = vld [vmem:[#allocation5_spill] sm:$0xff] }
  0x7a   : > { %3639 = vmatmul.mubr.msk.bf16.vlgmr.msra.gmra.mxu1 %vm852_vm1, %v4162_v49 }
  0x7b   : > { %3673 = vmatpush3.bf16.msra.mxu1 %v2231_v12  ;;  %3642 = vmatprep.mubr.msk.bf16.mxu1 %vm852_vm1, %v4174_v51 }
  0x7f   : > { %3661 = vmatmul.mubr.msk.bf16.gmra.mxu0 %vm852_vm1, %v4099_v36  ;;  %v5222_v36 = vld [vmem:[#allocation6_spill] sm:$0xff] }
  0x80   : > { %3664 = vmatprep.mubr.msk.bf16.mxu0 %vm852_vm1, %v4014_v32  ;;  %v5223_v32 = vld [vmem:[#allocation7_spill] sm:$0xff] }
  0x82   : > { %3643 = vmatmul.mubr.msk.bf16.gmra.mxu1 %vm852_vm1, %v5219_v18 }
  0x83   : > { %3646 = vmatprep.mubr.msk.bf16.mxu1 %vm852_vm1, %v5220_v39 }
  0x87   : > { %3665 = vmatmul.mubr.msk.bf16.gmra.mxu0 %vm852_vm1, %v4039_v53  ;;  %v3795_v53 = vld [vmem:[%s4183_s5 + $0x8] ss:$0 sps:$4 sm:$0x11]  }
  0x88   : > { %3668 = vmatprep.mubr.msk.bf16.mxu0 %vm852_vm1, %v4088_v20  ;;  %v801_v20 = vshll.u32 %v3794_v56, 16  ;;  %v806_v49 = vshll.u32 %v3795_v53, 16 }
  0x8a   : > { %3647 = vmatmul.mubr.msk.bf16.gmra.mxu1 %vm852_vm1, %v5221_v10  ;;  %v803_v14 = vrot.slane %v801_v20, 1 }
  0x8b   : > { %3650 = vmatprep.mubr.msk.bf16.mxu1 %vm852_vm1, %v5222_v36 }
  0x8f   : > { %3669 = vmatmul.mubr.msk.bf16.gmra.mxu0 %vm852_vm1, %v4111_v55  ;;  %v799_v55 = vshrl.u32 %v3794_v56, 16 }
  0x90   : > { %3692 = vmatprep.mubr.msk.bf16.mxu0 %vm852_vm1, %v4400_v9 }
  0x91   : > { %v804_v51 = vor.u32 %v803_v14, %v799_v55 }
  0x92   : > { %3651 = vmatmul.mubr.msk.bf16.gmra.mxu1 %vm852_vm1, %v5223_v32 }
  0x93   : > { %3674 = vmatprep.mubr.msk.bf16.mxu1 %vm852_vm1, %v4246_v41  ;;  %v808_v41 = vrot.slane %v806_v49, 1 }
  0x97   : > { %3693 = vmatmul.mubr.msk.bf16.vlgmr.msra.gmra.mxu0 %vm852_vm1, %v4417_v21 }
  0x98   : > { %3696 = vmatprep.mubr.msk.bf16.mxu0 %vm852_vm1, %v4436_v13 }
  0x9a   : > { %3675 = vmatmul.mubr.msk.bf16.vlgmr.msra.gmra.mxu1 %vm852_vm1, %v4275_v52  ;;  %v809_v52 = vsel %vm797_vm5, %v804_v51, %v808_v41 }
  0x9b   : > { %3678 = vmatprep.mubr.msk.bf16.mxu1 %vm852_vm1, %v4284_v26 }
  0x9f   : > { %3697 = vmatmul.mubr.msk.bf16.gmra.mxu0 %vm852_vm1, %v3174_v25 }
  0xa0   : > { %3700 = vmatprep.mubr.msk.bf16.mxu0 %vm852_vm1, %v3175_v50 }
  0xa2   : > { %3679 = vmatmul.mubr.msk.bf16.gmra.mxu1 %vm852_vm1, %v4304_v63 }
  0xa3   : > { %3682 = vmatprep.mubr.msk.bf16.mxu1 %vm852_vm1, %v3160_v60 }
  0xa7   : > { %3701 = vmatmul.mubr.msk.bf16.gmra.mxu0 %vm852_vm1, %v3176_v47 }
  0xa8   : > { %3704 = vmatprep.mubr.msk.bf16.mxu0 %vm852_vm1, %v3177_v22 }
  0xaa   : > { %3683 = vmatmul.mubr.msk.bf16.gmra.mxu1 %vm852_vm1, %v3161_v6 }
  0xab   : > { %3686 = vmatprep.mubr.msk.bf16.mxu1 %vm852_vm1, %v3162_v62 }
  0xaf   : > { %3705 = vmatmul.mubr.msk.bf16.gmra.mxu0 %vm852_vm1, %v809_v52 }
  0xb2   : > { %3687 = vmatmul.mubr.msk.bf16.gmra.mxu1 %vm852_vm1, %v3794_v56 }
  0xe5   : > { %v3550_v26 = vpop.f32.mrf.mxu0 }
  0xe6   : > { %v3402_v63 = vpack.c.bf16 %v3550_v26, %v3550_v26 }
  0xe7   : > { %v915_v1 = vpop.f32.mrf.mxu0 }
  0xe8   : > { %1045 = vst.msk [vmem:[%s4554_s14 + $0x8] sm:$0xf] %vm1042_vm6, %v3402_v63  ;;  %v3558_v4 = vpop.f32.mrf.mxu1  ;;  %v3400_v59 = vpack.c.bf16 %v915_v1, %v915_v1 }
  0xe9   : > { %v3410_v2 = vpack.c.bf16 %v3558_v4, %v3558_v4  ;;  %v3551_v9 = vpop.f32.mrf.mxu0 }
  0xea   : > { %1043 = vst.msk [vmem:[%s4554_s14] sm:$0xf] %vm1042_vm6, %v3400_v59  ;;  %v947_v21 = vpop.f32.mrf.mxu1  ;;  %v979_v43 = vpack.c.bf16 %v3551_v9, %v3550_v26  ;;  %v3403_v3 = vpack.c.bf16 %v3551_v9, %v3551_v9 }
  0xeb   : > { %1053 = vst.msk [vmem:[%s4554_s14 + $0x28] sm:$0xf] %vm1042_vm6, %v3410_v2  ;;  %v3408_v45 = vpack.c.bf16 %v947_v21, %v947_v21  ;;  %v918_v46 = vpop.f32.mrf.mxu0 }
  0xec   : > { %1046 = vst.msk [vmem:[%s4554_s14 + $0xc] sm:$0xf] %vm1042_vm6, %v3403_v3  ;;  %v1061_v58 = vunpack.c.l.bf16 %v979_v43  ;;  %v1062_v57 = vunpack.c.h.bf16 %v979_v43  ;;  %v3559_v13 = vpop.f32.mrf.mxu1  ;;  %v978_v42 = vpack.c.bf16 %v918_v46, %v915_v1  ;;  %v3401_v5 = vpack.c.bf16 %v918_v46, %v918_v46 }
  0xed   : > { %1051 = vst.msk [vmem:[%s4554_s14 + $0x20] sm:$0xf] %vm1042_vm6, %v3408_v45  ;;  %v983_v0 = vpack.c.bf16 %v3559_v13, %v3558_v4  ;;  %v3411_v34 = vpack.c.bf16 %v3559_v13, %v3559_v13 }
  0xee   : > { %v1079_v23 = vsel %vm1075_vm7, %v1061_v58, 0.0  ;;  %v4568_v61 = vsel %vm1075_vm7, %v1062_v57, 0.0  ;;  %v1116_v24 = vmul.f32 %v1061_v58, %v1061_v58  ;;  %v1117_v30 = vmul.f32 %v1062_v57, %v1062_v57  ;;  %1044 = vst.msk [vmem:[%s4554_s14 + $0x4] sm:$0xf] %vm1042_vm6, %v3401_v5  ;;  %v950_v17 = vpop.f32.mrf.mxu1 }
  0xef   : > { %1054 = vst.msk [vmem:[%s4554_s14 + $0x2c] sm:$0xf] %vm1042_vm6, %v3411_v34  ;;  %v1069_v29 = vunpack.c.l.bf16 %v983_v0  ;;  %v1070_v37 = vunpack.c.h.bf16 %v983_v0  ;;  %v1059_v19 = vunpack.c.l.bf16 %v978_v42  ;;  %v1060_v25 = vunpack.c.h.bf16 %v978_v42  ;;  %v3554_v27 = vpop.f32.mrf.mxu0 }
  0xf0   : > { %v1133_v38 = vsel %vm1075_vm7, %v1116_v24, 0.0  ;;  %v1135_v16 = vsel %vm1075_vm7, %v1117_v30, 0.0  ;;  %v982_v8 = vpack.c.bf16 %v950_v17, %v947_v21  ;;  %v3409_v33 = vpack.c.bf16 %v950_v17, %v950_v17 }
  0xf1   : > { %v4577_v15 = vsel %vm1075_vm7, %v1069_v29, 0.0  ;;  %v4580_v48 = vsel %vm1075_vm7, %v1070_v37, 0.0  ;;  %v1124_v60 = vmul.f32 %v1069_v29, %v1069_v29  ;;  %v1125_v50 = vmul.f32 %v1070_v37, %v1070_v37  ;;  %v931_v31 = vpop.f32.mrf.mxu0 }
  0xf2   : > { %v1076_v54 = vsel %vm1075_vm7, %v1059_v19, 0.0  ;;  %v1077_v28 = vsel %vm1075_vm7, %v1060_v25, 0.0  ;;  %v1114_v11 = vmul.f32 %v1059_v19, %v1059_v19  ;;  %v1115_v44 = vmul.f32 %v1060_v25, %v1060_v25  ;;  %1052 = vst.msk [vmem:[%s4554_s14 + $0x24] sm:$0xf] %vm1042_vm6, %v3409_v33  ;;  %v3562_v47 = vpop.f32.mrf.mxu1 }
  0xf3   : > { %v4587_v35 = vsel %vm1075_vm7, %v1124_v60, 0.0  ;;  %v4590_v7 = vsel %vm1075_vm7, %v1125_v50, 0.0  ;;  %v1078_v22 = vadd.f32 %v1077_v28, %v1076_v54  ;;  %v1067_v6 = vunpack.c.l.bf16 %v982_v8  ;;  %v3555_v62 = vpop.f32.mrf.mxu0 }
  0xf4   : > { %v1130_v56 = vsel %vm1075_vm7, %v1114_v11, 0.0  ;;  %v1131_v40 = vsel %vm1075_vm7, %v1115_v44, 0.0  ;;  %v1068_v12 = vunpack.c.h.bf16 %v982_v8  ;;  %v3406_v18 = vpack.c.bf16 %v3554_v27, %v3554_v27  ;;  %v963_v39 = vpop.f32.mrf.mxu1 }
  0xf5   : > { %v1080_v10 = vadd.f32 %v1079_v23, %v1078_v22  ;;  %v1132_v36 = vadd.f32 %v1131_v40, %v1130_v56  ;;  %v4595_v32 = vsel %vm1075_vm7, %v1067_v6, 0.0  ;;  %v1122_v53 = vmul.f32 %v1067_v6, %v1067_v6  ;;  %v934_v20 = vpop.f32.mrf.mxu0 }
  0xf6   : > { %v4598_v55 = vsel %vm1075_vm7, %v1068_v12, 0.0  ;;  %v1123_v14 = vmul.f32 %v1068_v12, %v1068_v12  ;;  %1049 = vst.msk [vmem:[%s4554_s14 + $0x18] sm:$0xf] %vm1042_vm6, %v3406_v18  ;;  %v3414_v49 = vpack.c.bf16 %v3562_v47, %v3562_v47  ;;  %v3404_v51 = vpack.c.bf16 %v931_v31, %v931_v31  ;;  %v3563_v41 = vpop.f32.mrf.mxu1 }
  0xf7   : > { %v1134_v52 = vadd.f32 %v1133_v38, %v1132_v36  ;;  %v4603_v26 = vsel %vm1075_vm7, %v1122_v53, 0.0  ;;  %v3412_v63 = vpack.c.bf16 %v963_v39, %v963_v39  ;;  %v981_v1 = vpack.c.bf16 %v3555_v62, %v3554_v27  ;;  %v3586_v4 = vpop.f32.mrf.mxu0 }
  0xf8   : > { %v4606_v59 = vsel %vm1075_vm7, %v1123_v14, 0.0  ;;  %1057 = vst.msk [vmem:[%s4554_s14 + $0x38] sm:$0xf] %vm1042_vm6, %v3414_v49  ;;  %1047 = vst.msk [vmem:[%s4554_s14 + $0x10] sm:$0xf] %vm1042_vm6, %v3404_v51  ;;  %v3407_v2 = vpack.c.bf16 %v3555_v62, %v3555_v62  ;;  %v985_v9 = vpack.c.bf16 %v3563_v41, %v3562_v47  ;;  %v3415_v21 = vpack.c.bf16 %v3563_v41, %v3563_v41  ;;  %v966_v43 = vpop.f32.mrf.mxu1 }
  0xf9   : > { %1055 = vst.msk [vmem:[%s4554_s14 + $0x30] sm:$0xf] %vm1042_vm6, %v3412_v63  ;;  %v1065_v3 = vunpack.c.l.bf16 %v981_v1  ;;  %v1066_v45 = vunpack.c.h.bf16 %v981_v1  ;;  %v980_v46 = vpack.c.bf16 %v934_v20, %v931_v31  ;;  %v3405_v58 = vpack.c.bf16 %v934_v20, %v934_v20  ;;  %v1357_v57 = vpop.f32.mrf.mxu0 }
  0xfa   : > { %1050 = vst.msk [vmem:[%s4554_s14 + $0x1c] sm:$0xf] %vm1042_vm6, %v3407_v2  ;;  %1058 = vst.msk [vmem:[%s4554_s14 + $0x3c] sm:$0xf] %vm1042_vm6, %v3415_v21  ;;  %v1073_v13 = vunpack.c.l.bf16 %v985_v9  ;;  %v1074_v42 = vunpack.c.h.bf16 %v985_v9  ;;  %v1082_v5 = vadd.f32 %v4568_v61, %v1080_v10  ;;  %v1136_v0 = vadd.f32 %v1135_v16, %v1134_v52  ;;  %v3568_v34 = vpop.f32.mrf.mxu1 }
  0xfb   : > { %v1087_v23 = vsel %vm1075_vm7, %v1065_v3, 0.0  ;;  %v1089_v24 = vsel %vm1075_vm7, %v1066_v45, 0.0  ;;  %v1120_v30 = vmul.f32 %v1065_v3, %v1065_v3  ;;  %v1121_v17 = vmul.f32 %v1066_v45, %v1066_v45  ;;  %1048 = vst.msk [vmem:[%s4554_s14 + $0x14] sm:$0xf] %vm1042_vm6, %v3405_v58  ;;  %v3587_v29 = vpop.f32.mrf.mxu0 }
  0xfc   : > { %v4624_v37 = vsel %vm1075_vm7, %v1073_v13, 0.0  ;;  %v4627_v19 = vsel %vm1075_vm7, %v1074_v42, 0.0  ;;  %v1128_v25 = vmul.f32 %v1073_v13, %v1073_v13  ;;  %v1129_v27 = vmul.f32 %v1074_v42, %v1074_v42  ;;  %v1257_v61 = vpop.f32.mrf.mxu1 }
  0xfd   : > { %v1141_v38 = vsel %vm1075_vm7, %v1120_v30, 0.0  ;;  %v1143_v16 = vsel %vm1075_vm7, %v1121_v17, 0.0  ;;  %v1063_v8 = vunpack.c.l.bf16 %v980_v46  ;;  %v1064_v33 = vunpack.c.h.bf16 %v980_v46  ;;  %v1360_v60 = vpop.f32.mrf.mxu0 }
  0xfe   : > { %v4632_v50 = vsel %vm1075_vm7, %v1128_v25, 0.0  ;;  %v4635_v31 = vsel %vm1075_vm7, %v1129_v27, 0.0  ;;  %v984_v54 = vpack.c.bf16 %v966_v43, %v963_v39  ;;  %v3413_v28 = vpack.c.bf16 %v966_v43, %v966_v43  ;;  %v3569_v11 = vpop.f32.mrf.mxu1 }
  0xff   : > { %v1083_v44 = vsel %vm1075_vm7, %v1063_v8, 0.0  ;;  %v1085_v47 = vsel %vm1075_vm7, %v1064_v33, 0.0  ;;  %v1118_v22 = vmul.f32 %v1063_v8, %v1063_v8  ;;  %v1119_v6 = vmul.f32 %v1064_v33, %v1064_v33  ;;  %v3590_v62 = vpop.f32.mrf.mxu0 }
 0x100   : > { %v1084_v56 = vadd.f32 %v1083_v44, %v1082_v5  ;;  %1056 = vst.msk [vmem:[%s4554_s14 + $0x34] sm:$0xf] %vm1042_vm6, %v3413_v28  ;;  %v1071_v40 = vunpack.c.l.bf16 %v984_v54  ;;  %v1072_v12 = vunpack.c.h.bf16 %v984_v54  ;;  %v1366_v18 = vadd.f32 %v3586_v4, %v3568_v34  ;;  %v1260_v10 = vpop.f32.mrf.mxu1 }
 0x101   : > { %v1137_v36 = vsel %vm1075_vm7, %v1118_v22, 0.0  ;;  %v1139_v39 = vsel %vm1075_vm7, %v1119_v6, 0.0  ;;  %v1358_v53 = vadd.f32 %v1357_v57, %v1257_v61  ;;  %v1369_v20 = vadd.f32 %v3587_v29, %v3569_v11  ;;  %v1373_v14 = vpop.f32.mrf.mxu0 }
 0x102   : > { %v1086_v49 = vadd.f32 %v1085_v47, %v1084_v56  ;;  %v1138_v51 = vadd.f32 %v1137_v36, %v1136_v0  ;;  %v4644_v41 = vsel %vm1075_vm7, %v1071_v40, 0.0  ;;  %v4647_v52 = vsel %vm1075_vm7, %v1072_v12, 0.0  ;;  %v3572_v63 = vpop.f32.mrf.mxu1 }
 0x103   : > { %v1126_v1 = vmul.f32 %v1071_v40, %v1071_v40  ;;  %v1127_v4 = vmul.f32 %v1072_v12, %v1072_v12  ;;  %v3418_v2 = vpack.c.bf16 %v1366_v18, %v1366_v18  ;;  %v3416_v9 = vpack.c.bf16 %v1358_v53, %v1358_v53  ;;  %v3591_v21 = vpop.f32.mrf.mxu0 }
 0x104   : > { %v1088_v43 = vadd.f32 %v1087_v23, %v1086_v49  ;;  %v1140_v3 = vadd.f32 %v1139_v39, %v1138_v51  ;;  %v1421_v45 = vpack.c.bf16 %v1369_v20, %v1366_v18  ;;  %v3419_v46 = vpack.c.bf16 %v1369_v20, %v1369_v20  ;;  %v1273_v58 = vpop.f32.mrf.mxu1 }
 0x105   : > { %v4650_v57 = vsel %vm1075_vm7, %v1126_v1, 0.0  ;;  %v4653_v13 = vsel %vm1075_vm7, %v1127_v4, 0.0  ;;  %3256 = vst.msk [vmem:[%s4554_s14 + $0x48] sm:$0xf] %vm1042_vm6, %v3418_v2  ;;  %3254 = vst.msk [vmem:[%s4554_s14 + $0x40] sm:$0xf] %vm1042_vm6, %v3416_v9  ;;  %v1361_v42 = vadd.f32 %v1360_v60, %v1260_v10  ;;  %v1382_v5 = vadd.f32 %v3590_v62, %v3572_v63  ;;  %v1376_v0 = vpop.f32.mrf.mxu0 }
 0x106   : > { %v1090_v34 = vadd.f32 %v1089_v24, %v1088_v43  ;;  %v1142_v30 = vadd.f32 %v1141_v38, %v1140_v3  ;;  %3257 = vst.msk [vmem:[%s4554_s14 + $0x4c] sm:$0xf] %vm1042_vm6, %v3419_v46  ;;  %v1503_v23 = vunpack.c.l.bf16 %v1421_v45  ;;  %v1504_v17 = vunpack.c.h.bf16 %v1421_v45  ;;  %v3573_v29 = vpop.f32.mrf.mxu1 }
 0x107   : > { %v1420_v25 = vpack.c.bf16 %v1361_v42, %v1358_v53  ;;  %v3417_v27 = vpack.c.bf16 %v1361_v42, %v1361_v42  ;;  %v3422_v61 = vpack.c.bf16 %v1382_v5, %v1382_v5  ;;  %v1374_v8 = vadd.f32 %v1373_v14, %v1273_v58  ;;  %v4661_v33 = vpop.f32.mrf.mxu0 }
 0x108   : > { %v1092_v54 = vadd.f32 %v4595_v32, %v1090_v34  ;;  %v1144_v60 = vadd.f32 %v1143_v16, %v1142_v30  ;;  %v1520_v28 = vsel %vm1075_vm7, %v1503_v23, 0.0  ;;  %v1522_v24 = vsel %vm1075_vm7, %v1504_v17, 0.0  ;;  %v1276_v38 = vpop.f32.mrf.mxu1 }
 0x109   : > { %v1557_v11 = vmul.f32 %v1503_v23, %v1503_v23  ;;  %v1558_v44 = vmul.f32 %v1504_v17, %v1504_v17  ;;  %3255 = vst.msk [vmem:[%s4554_s14 + $0x44] sm:$0xf] %vm1042_vm6, %v3417_v27  ;;  %v1501_v47 = vunpack.c.l.bf16 %v1420_v25  ;;  %v1502_v22 = vunpack.c.h.bf16 %v1420_v25  ;;  %3260 = vst.msk [vmem:[%s4554_s14 + $0x58] sm:$0xf] %vm1042_vm6, %v3422_v61  ;;  %v4670_v6 = vpop.f32.mrf.mxu0 }
 0x10a   : > { %v1146_v62 = vadd.f32 %v4603_v26, %v1144_v60  ;;  %v1094_v32 = vadd.f32 %v4598_v55, %v1092_v54  ;;  %v3420_v16 = vpack.c.bf16 %v1374_v8, %v1374_v8  ;;  %v1385_v56 = vadd.f32 %v3591_v21, %v3573_v29  ;;  %v3576_v40 = vpop.f32.mrf.mxu1 }
 0x10b   : > { %v1574_v12 = vsel %vm1075_vm7, %v1557_v11, 0.0  ;;  %v1576_v18 = vsel %vm1075_vm7, %v1558_v44, 0.0  ;;  %v1517_v10 = vsel %vm1075_vm7, %v1501_v47, 0.0  ;;  %v1518_v36 = vsel %vm1075_vm7, %v1502_v22, 0.0  ;;  %v4678_v39 = vpop.f32.mrf.mxu0 }
 0x10c   : > { %v1096_v53 = vadd.f32 %v4577_v15, %v1094_v32  ;;  %v1148_v20 = vadd.f32 %v4606_v59, %v1146_v62  ;;  %v1519_v26 = vadd.f32 %v1518_v36, %v1517_v10  ;;  %v1555_v55 = vmul.f32 %v1501_v47, %v1501_v47  ;;  %3258 = vst.msk [vmem:[%s4554_s14 + $0x50] sm:$0xf] %vm1042_vm6, %v3420_v16  ;;  %v1289_v14 = vpop.f32.mrf.mxu1 }
 0x10d   : > { %v1556_v49 = vmul.f32 %v1502_v22, %v1502_v22  ;;  %v1423_v51 = vpack.c.bf16 %v1385_v56, %v1382_v5  ;;  %v3423_v63 = vpack.c.bf16 %v1385_v56, %v1385_v56  ;;  %v1377_v1 = vadd.f32 %v1376_v0, %v1276_v38  ;;  %v1392_v4 = vpop.f32.mrf.mxu0 }
 0x10e   : > { %v1098_v2 = vadd.f32 %v4580_v48, %v1096_v53  ;;  %v1150_v9 = vadd.f32 %v4587_v35, %v1148_v20  ;;  %v1521_v21 = vadd.f32 %v1520_v28, %v1519_v26  ;;  %v1571_v15 = vsel %vm1075_vm7, %v1555_v55, 0.0  ;;  %v3577_v43 = vpop.f32.mrf.mxu1 }
 0x10f   : > { %v1572_v59 = vsel %vm1075_vm7, %v1556_v49, 0.0  ;;  %3261 = vst.msk [vmem:[%s4554_s14 + $0x5c] sm:$0xf] %vm1042_vm6, %v3423_v63  ;;  %v1507_v3 = vunpack.c.l.bf16 %v1423_v51  ;;  %v1508_v45 = vunpack.c.h.bf16 %v1423_v51  ;;  %v1422_v46 = vpack.c.bf16 %v1377_v1, %v1374_v8  ;;  %v4690_v58 = vpop.f32.mrf.mxu0 }
 0x110   : > { %v1100_v42 = vadd.f32 %v4644_v41, %v1098_v2  ;;  %v1152_v48 = vadd.f32 %v4590_v7, %v1150_v9  ;;  %v1573_v5 = vadd.f32 %v1572_v59, %v1571_v15  ;;  %v3421_v35 = vpack.c.bf16 %v1377_v1, %v1377_v1  ;;  %v1292_v0 = vpop.f32.mrf.mxu1 }
 0x111   : > { %v1528_v34 = vsel %vm1075_vm7, %v1507_v3, 0.0  ;;  %v1530_v30 = vsel %vm1075_vm7, %v1508_v45, 0.0  ;;  %v1561_v23 = vmul.f32 %v1507_v3, %v1507_v3  ;;  %v1562_v17 = vmul.f32 %v1508_v45, %v1508_v45  ;;  %v4696_v29 = vpop.f32.mrf.mxu0 }
 0x112   : > { %v1102_v25 = vadd.f32 %v4647_v52, %v1100_v42  ;;  %v1154_v27 = vadd.f32 %v4650_v57, %v1152_v48  ;;  %v1575_v61 = vadd.f32 %v1574_v12, %v1573_v5  ;;  %3259 = vst.msk [vmem:[%s4554_s14 + $0x54] sm:$0xf] %vm1042_vm6, %v3421_v35  ;;  %v1505_v41 = vunpack.c.l.bf16 %v1422_v46  ;;  %v3580_v7 = vpop.f32.mrf.mxu1 }
 0x113   : > { %v1582_v8 = vsel %vm1075_vm7, %v1561_v23, 0.0  ;;  %v1584_v54 = vsel %vm1075_vm7, %v1562_v17, 0.0  ;;  %v1506_v60 = vunpack.c.h.bf16 %v1422_v46  ;;  %v1523_v28 = vadd.f32 %v1522_v24, %v1521_v21  ;;  %v4704_v38 = vpop.f32.mrf.mxu0 }
 0x114   : > { %v1104_v11 = vadd.f32 %v4624_v37, %v1102_v25  ;;  %v1156_v44 = vadd.f32 %v4653_v13, %v1154_v27  ;;  %v1524_v52 = vsel %vm1075_vm7, %v1505_v41, 0.0  ;;  %v1559_v57 = vmul.f32 %v1505_v41, %v1505_v41  ;;  %v4709_v47 = vpop.f32.mrf.mxu1 }
 0x115   : > { %v1525_v22 = vadd.f32 %v1524_v52, %v1523_v28  ;;  %v1526_v62 = vsel %vm1075_vm7, %v1506_v60, 0.0  ;;  %v1560_v32 = vmul.f32 %v1506_v60, %v1506_v60  ;;  %v1577_v16 = vadd.f32 %v1576_v18, %v1575_v61  ;;  %v4712_v56 = vpop.f32.mrf.mxu0 }
 0x116   : > { %v1106_v24 = vadd.f32 %v4627_v19, %v1104_v11  ;;  %v1158_v12 = vadd.f32 %v4632_v50, %v1156_v44  ;;  %v1578_v37 = vsel %vm1075_vm7, %v1559_v57, 0.0  ;;  %v1398_v13 = vadd.f32 %v4661_v33, %v3576_v40  ;;  %v4718_v10 = vpop.f32.mrf.mxu1 }
 0x117   : > { %v1527_v36 = vadd.f32 %v1526_v62, %v1525_v22  ;;  %v1579_v53 = vadd.f32 %v1578_v37, %v1577_v16  ;;  %v1580_v20 = vsel %vm1075_vm7, %v1560_v32, 0.0  ;;  %v1390_v26 = vadd.f32 %v4670_v6, %v1289_v14  ;;  %v4722_v18 = vpop.f32.mrf.mxu0 }
 0x118   : > { %v1107_v55 = vrot.slane %v1106_v24, 4  ;;  %v1160_v19 = vadd.f32 %v4635_v31, %v1158_v12  ;;  %v3426_v50 = vpack.c.bf16 %v1398_v13, %v1398_v13  ;;  %v1401_v49 = vadd.f32 %v4678_v39, %v3577_v43  ;;  %v1308_v51 = vpop.f32.mrf.mxu1 }
 0x119   : > { %v1529_v33 = vadd.f32 %v1528_v34, %v1527_v36  ;;  %v1581_v40 = vadd.f32 %v1580_v20, %v1579_v53  ;;  %v3424_v63 = vpack.c.bf16 %v1390_v26, %v1390_v26  ;;  %v1393_v1 = vadd.f32 %v1392_v4, %v1292_v0  ;;  %v4726_v2 = vpop.f32.mrf.mxu0 }
 0x11a   : > { %v1108_v9 = vadd.f32 %v1107_v55, %v1106_v24  ;;  %v1161_v21 = vrot.slane %v1160_v19, 4  ;;  %3264 = vst.msk [vmem:[%s4554_s14 + $0x68] sm:$0xf] %vm1042_vm6, %v3426_v50  ;;  %v1425_v6 = vpack.c.bf16 %v1401_v49, %v1398_v13  ;;  %v3427_v14 = vpack.c.bf16 %v1401_v49, %v1401_v49  ;;  %v3604_v31 = vpop.f32.mrf.mxu1 }
 0x11b   : > { %v1583_v15 = vadd.f32 %v1582_v8, %v1581_v40  ;;  %3262 = vst.msk [vmem:[%s4554_s14 + $0x60] sm:$0xf] %vm1042_vm6, %v3424_v63  ;;  %v1424_v39 = vpack.c.bf16 %v1393_v1, %v1390_v26  ;;  %v3425_v43 = vpack.c.bf16 %v1393_v1, %v1393_v1  ;;  %v1531_v59 = vadd.f32 %v1530_v30, %v1529_v33  ;;  %v4732_v3 = vpop.f32.mrf.mxu0 }
 0x11c   : > { %v1109_v4 = vrot.slane %v1108_v9, 2  ;;  %v1162_v45 = vadd.f32 %v1161_v21, %v1160_v19  ;;  %3265 = vst.msk [vmem:[%s4554_s14 + $0x6c] sm:$0xf] %vm1042_vm6, %v3427_v14  ;;  %v1511_v46 = vunpack.c.l.bf16 %v1425_v6  ;;  %v1512_v42 = vunpack.c.h.bf16 %v1425_v6  ;;  %v4736_v48 = vpop.f32.mrf.mxu1 }
 0x11d   : > { %3263 = vst.msk [vmem:[%s4554_s14 + $0x64] sm:$0xf] %vm1042_vm6, %v3425_v43  ;;  %v1509_v5 = vunpack.c.l.bf16 %v1424_v39  ;;  %v1510_v35 = vunpack.c.h.bf16 %v1424_v39  ;;  %v1585_v0 = vadd.f32 %v1584_v54, %v1583_v15  ;;  %v1414_v34 = vadd.f32 %v4690_v58, %v3580_v7  ;;  %v4741_v23 = vpop.f32.mrf.mxu0 }
 0x11e   : > { %v1110_v30 = vadd.f32 %v1109_v4, %v1108_v9  ;;  %v1163_v17 = vrot.slane %v1162_v45, 2  ;;  %v1536_v25 = vsel %vm1075_vm7, %v1511_v46, 0.0  ;;  %v3605_v27 = vpop.f32.mrf.mxu1  ;;  %v1538_v61 = vsel %vm1075_vm7, %v1512_v42, 0.0 }
 0x11f   : > { %v1565_v41 = vmul.f32 %v1511_v46, %v1511_v46  ;;  %v1566_v8 = vmul.f32 %v1512_v42, %v1512_v42  ;;  %v1532_v60 = vsel %vm1075_vm7, %v1509_v5, 0.0  ;;  %v4746_v28 = vpop.f32.mrf.mxu0  ;;  %v1563_v58 = vmul.f32 %v1509_v5, %v1509_v5 }
 0x120   : > { %v1111_v11 = vrot.slane %v1110_v30, 1  ;;  %v1164_v44 = vadd.f32 %v1163_v17, %v1162_v45  ;;  %v1533_v54 = vadd.f32 %v1532_v60, %v1531_v59  ;;  %v1676_v7 = vpop.f32.mrf.mxu1  ;;  %v1534_v57 = vsel %vm1075_vm7, %v1510_v35, 0.0 }
 0x121   : > { %v1590_v52 = vsel %vm1075_vm7, %v1565_v41, 0.0  ;;  %v1564_v22 = vmul.f32 %v1510_v35, %v1510_v35  ;;  %v3430_v62 = vpack.c.bf16 %v1414_v34, %v1414_v34  ;;  %v4750_v32 = vpop.f32.mrf.mxu0  ;;  %v1592_v24 = vsel %vm1075_vm7, %v1566_v8, 0.0 }
 0x122   : > { %v4752_v16 = vadd.f32 %v1111_v11, %v1110_v30  ;;  %v1535_v12 = vadd.f32 %v1534_v57, %v1533_v54  ;;  %v1586_v37 = vsel %vm1075_vm7, %v1563_v58, 0.0  ;;  %v4756_v13 = vpop.f32.mrf.mxu1  ;;  %v1165_v36 = vrot.slane %v1164_v44, 1 }
 0x123   : > { %v1587_v53 = vadd.f32 %v1586_v37, %v1585_v0  ;;  %3268 = vst.msk [vmem:[%s4554_s14 + $0x78] sm:$0xf] %vm1042_vm6, %v3430_v62  ;;  %v1406_v20 = vadd.f32 %v4696_v29, %v4709_v47  ;;  %v1417_v26 = vadd.f32 %v4704_v38, %v4718_v10  ;;  %v4764_v55 = vpop.f32.mrf.mxu0  ;;  %v1588_v50 = vsel %vm1075_vm7, %v1564_v22, 0.0 }
 0x124   : > { %v1537_v19 = vadd.f32 %v1536_v25, %v1535_v12  ;;  %v1409_v49 = vadd.f32 %v4712_v56, %v1308_v51  ;;  %v1782_v33 = vadd.f32 %v4722_v18, %v3604_v31  ;;  %v4769_v40 = vpop.f32.mrf.mxu1  ;;  %v4775_v56 = vadd.f32 %v1165_v36, %v1164_v44 }
 0x125   : > { %v1589_v63 = vadd.f32 %v1588_v50, %v1587_v53  ;;  %v3428_v1 = vpack.c.bf16 %v1406_v20, %v1406_v20  ;;  %v1427_v29 = vpack.c.bf16 %v1417_v26, %v1414_v34  ;;  %v3431_v47 = vpack.c.bf16 %v1417_v26, %v1417_v26  ;;  %v4771_v9 = vpop.f32.mrf.mxu0 }
 0x126   : > { %v1426_v38 = vpack.c.bf16 %v1409_v49, %v1406_v20  ;;  %v3429_v10 = vpack.c.bf16 %v1409_v49, %v1409_v49  ;;  %v1539_v21 = vadd.f32 %v1538_v61, %v1537_v19  ;;  %v3434_v6 = vpack.c.bf16 %v1782_v33, %v1782_v33  ;;  %v4773_v14 = vpop.f32.mrf.mxu1 }
 0x127   : > { %v1591_v51 = vadd.f32 %v1590_v52, %v1589_v63  ;;  %3266 = vst.msk [vmem:[%s4554_s14 + $0x70] sm:$0xf] %vm1042_vm6, %v3428_v1  ;;  %3269 = vst.msk [vmem:[%s4554_s14 + $0x7c] sm:$0xf] %vm1042_vm6, %v3431_v47  ;;  %v1515_v18 = vunpack.c.l.bf16 %v1427_v29  ;;  %v1516_v31 = vunpack.c.h.bf16 %v1427_v29  ;;  %v4781_v15 = vpop.f32.mrf.mxu0  ;;  %v1774_v59 = vadd.f32 %v4726_v2, %v4736_v48 }
 0x128   : > { %3267 = vst.msk [vmem:[%s4554_s14 + $0x74] sm:$0xf] %vm1042_vm6, %v3429_v10  ;;  %v1513_v39 = vunpack.c.l.bf16 %v1426_v38  ;;  %v1514_v43 = vunpack.c.h.bf16 %v1426_v38  ;;  %3306 = vst.msk [vmem:[%s4554_s14 + $0x88] sm:$0xf] %vm1042_vm6, %v3434_v6  ;;  %v1785_v4 = vadd.f32 %v4732_v3, %v3605_v27  ;;  %v4790_v45 = vpop.f32.mrf.mxu1  ;;  %v1777_v35 = vadd.f32 %v4741_v23, %v1676_v7 }
 0x129   : > { %v1544_v46 = vsel %vm1075_vm7, %v1515_v18, 0.0  ;;  %v1546_v42 = vsel %vm1075_vm7, %v1516_v31, 0.0  ;;  %v1569_v5 = vmul.f32 %v1515_v18, %v1515_v18  ;;  %v4795_v0 = vpop.f32.mrf.mxu0  ;;  %v1570_v34 = vmul.f32 %v1516_v31, %v1516_v31 }
 0x12a   : > { %v1540_v30 = vsel %vm1075_vm7, %v1513_v39, 0.0  ;;  %v1567_v17 = vmul.f32 %v1513_v39, %v1513_v39  ;;  %v1568_v25 = vmul.f32 %v1514_v43, %v1514_v43  ;;  %v4798_v61 = vpop.f32.mrf.mxu1  ;;  %v1542_v48 = vsel %vm1075_vm7, %v1514_v43, 0.0 }
 0x12b   : > { %v1598_v2 = vsel %vm1075_vm7, %v1569_v5, 0.0  ;;  %v1541_v3 = vadd.f32 %v1540_v30, %v1539_v21  ;;  %v1593_v27 = vadd.f32 %v1592_v24, %v1591_v51  ;;  %v4802_v41 = vpop.f32.mrf.mxu0  ;;  %v3432_v60 = vpack.c.bf16 %v1774_v59, %v1774_v59 }
 0x12c   : > { %v1594_v23 = vsel %vm1075_vm7, %v1567_v17, 0.0  ;;  %v1596_v8 = vsel %vm1075_vm7, %v1568_v25, 0.0  ;;  %v1837_v11 = vpack.c.bf16 %v1785_v4, %v1782_v33  ;;  %v4806_v44 = vpop.f32.mrf.mxu1  ;;  %v3435_v7 = vpack.c.bf16 %v1785_v4, %v1785_v4 }
 0x12d   : > { %v1543_v54 = vadd.f32 %v1542_v48, %v1541_v3  ;;  %v1595_v58 = vadd.f32 %v1594_v23, %v1593_v27  ;;  %v1836_v52 = vpack.c.bf16 %v1777_v35, %v1774_v59  ;;  %v4808_v57 = vpop.f32.mrf.mxu0  ;;  %3304 = vst.msk [vmem:[%s4554_s14 + $0x80] sm:$0xf] %vm1042_vm6, %v3432_v60  ;;  %v3433_v24 = vpack.c.bf16 %v1777_v35, %v1777_v35 }
 0x12e   : > { %v1919_v22 = vunpack.c.l.bf16 %v1837_v11  ;;  %v1920_v62 = vunpack.c.h.bf16 %v1837_v11  ;;  %v1798_v12 = vadd.f32 %v4746_v28, %v4756_v13  ;;  %v4814_v37 = vpop.f32.mrf.mxu1  ;;  %3307 = vst.msk [vmem:[%s4554_s14 + $0x8c] sm:$0xf] %vm1042_vm6, %v3435_v7  ;;  %v1600_v50 = vsel %vm1075_vm7, %v1570_v34, 0.0 }
 0x12f   : > { %v1545_v36 = vadd.f32 %v1544_v46, %v1543_v54  ;;  %v1597_v53 = vadd.f32 %v1596_v8, %v1595_v58  ;;  %v1917_v20 = vunpack.c.l.bf16 %v1836_v52  ;;  %v1918_v26 = vunpack.c.h.bf16 %v1836_v52  ;;  %v4818_v19 = vpop.f32.mrf.mxu0  ;;  %3305 = vst.msk [vmem:[%s4554_s14 + $0x84] sm:$0xf] %vm1042_vm6, %v3433_v24 }
 0x130   : > { %v1936_v49 = vsel %vm1075_vm7, %v1919_v22, 0.0  ;;  %v1938_v33 = vsel %vm1075_vm7, %v1920_v62, 0.0  ;;  %v1973_v63 = vmul.f32 %v1919_v22, %v1919_v22  ;;  %v4825_v28 = vpop.f32.mrf.mxu1  ;;  %v1974_v10 = vmul.f32 %v1920_v62, %v1920_v62 }
 0x131   : > { %v1547_v13 = vadd.f32 %v1546_v42, %v1545_v36  ;;  %v1599_v1 = vadd.f32 %v1598_v2, %v1597_v53  ;;  %v1933_v29 = vsel %vm1075_vm7, %v1917_v20, 0.0  ;;  %v1934_v47 = vsel %vm1075_vm7, %v1918_v26, 0.0  ;;  %v4829_v38 = vpop.f32.mrf.mxu0 }
 0x132   : > { %v1990_v21 = vsel %vm1075_vm7, %v1973_v63, 0.0  ;;  %v1935_v6 = vadd.f32 %v1934_v47, %v1933_v29  ;;  %v1971_v51 = vmul.f32 %v1917_v20, %v1917_v20  ;;  %v4832_v18 = vpop.f32.mrf.mxu1  ;;  %v1972_v43 = vmul.f32 %v1918_v26, %v1918_v26 }
 0x133   : > { %v1548_v31 = vrot.slane %v1547_v13, 4  ;;  %v1601_v39 = vadd.f32 %v1600_v50, %v1599_v1  ;;  %v3438_v59 = vpack.c.bf16 %v1798_v12, %v1798_v12  ;;  %v4834_v4 = vpop.f32.mrf.mxu0  ;;  %v1790_v5 = vadd.f32 %v4750_v32, %v4769_v40 }
 0x134   : > { %v1937_v46 = vadd.f32 %v1936_v49, %v1935_v6  ;;  %v1987_v42 = vsel %vm1075_vm7, %v1971_v51, 0.0  ;;  %v1801_v35 = vadd.f32 %v4764_v55, %v4773_v14  ;;  %v4841_v34 = vpop.f32.mrf.mxu1  ;;  %v1988_v25 = vsel %vm1075_vm7, %v1972_v43, 0.0 }
 0x135   : > { %v1549_v30 = vadd.f32 %v1548_v31, %v1547_v13  ;;  %v1602_v17 = vrot.slane %v1601_v39, 4  ;;  %3310 = vst.msk [vmem:[%s4554_s14 + $0x98] sm:$0xf] %vm1042_vm6, %v3438_v59  ;;  %v1793_v2 = vadd.f32 %v4771_v9, %v4790_v45  ;;  %v4848_v3 = vpop.f32.mrf.mxu0  ;;  %v1989_v48 = vadd.f32 %v1988_v25, %v1987_v42 }
 0x136   : > { %v3436_v32 = vpack.c.bf16 %v1790_v5, %v1790_v5  ;;  %v1839_v40 = vpack.c.bf16 %v1801_v35, %v1798_v12  ;;  %v3439_v27 = vpack.c.bf16 %v1801_v35, %v1801_v35  ;;  %v4850_v55 = vpop.f32.mrf.mxu1  ;;  %v1939_v58 = vadd.f32 %v1938_v33, %v1937_v46 }
 0x137   : > { %v1550_v14 = vrot.slane %v1549_v30, 2  ;;  %v1603_v23 = vadd.f32 %v1602_v17, %v1601_v39  ;;  %v1838_v8 = vpack.c.bf16 %v1793_v2, %v1790_v5  ;;  %v3437_v60 = vpack.c.bf16 %v1793_v2, %v1793_v2  ;;  %v4852_v11 = vpop.f32.mrf.mxu0 }
 0x138   : > { %v1991_v54 = vadd.f32 %v1990_v21, %v1989_v48  ;;  %3308 = vst.msk [vmem:[%s4554_s14 + $0x90] sm:$0xf] %vm1042_vm6, %v3436_v32  ;;  %3311 = vst.msk [vmem:[%s4554_s14 + $0x9c] sm:$0xf] %vm1042_vm6, %v3439_v27  ;;  %v1923_v9 = vunpack.c.l.bf16 %v1839_v40  ;;  %v1924_v45 = vunpack.c.h.bf16 %v1839_v40  ;;  %v4858_v7 = vpop.f32.mrf.mxu1  ;;  %v1992_v36 = vsel %vm1075_vm7, %v1974_v10, 0.0 }
 0x139   : > { %v1551_v52 = vadd.f32 %v1550_v14, %v1549_v30  ;;  %v1604_v22 = vrot.slane %v1603_v23, 2  ;;  %3309 = vst.msk [vmem:[%s4554_s14 + $0x94] sm:$0xf] %vm1042_vm6, %v3437_v60  ;;  %v1921_v62 = vunpack.c.l.bf16 %v1838_v8  ;;  %v1922_v24 = vunpack.c.h.bf16 %v1838_v8  ;;  %v4862_v12 = vpop.f32.mrf.mxu0 }
 0x13a   : > { %v1944_v53 = vsel %vm1075_vm7, %v1923_v9, 0.0  ;;  %v1946_v20 = vsel %vm1075_vm7, %v1924_v45, 0.0  ;;  %v1977_v26 = vmul.f32 %v1923_v9, %v1923_v9  ;;  %v4867_v50 = vpop.f32.mrf.mxu1  ;;  %v1978_v63 = vmul.f32 %v1924_v45, %v1924_v45 }
 0x13b   : > { %v1552_v49 = vrot.slane %v1551_v52, 1  ;;  %v1605_v33 = vadd.f32 %v1604_v22, %v1603_v23  ;;  %v1940_v13 = vsel %vm1075_vm7, %v1921_v62, 0.0  ;;  %v4870_v1 = vpop.f32.mrf.mxu0  ;;  %v1942_v21 = vsel %vm1075_vm7, %v1922_v24, 0.0 }
 0x13c   : > { %v1998_v29 = vsel %vm1075_vm7, %v1977_v26, 0.0  ;;  %v1941_v47 = vadd.f32 %v1940_v13, %v1939_v58  ;;  %v1975_v10 = vmul.f32 %v1921_v62, %v1921_v62  ;;  %v4874_v6 = vpop.f32.mrf.mxu1  ;;  %v1976_v39 = vmul.f32 %v1922_v24, %v1922_v24 }
 0x13d   : > { %v1553_v51 = vadd.f32 %v1552_v49, %v1551_v52  ;;  %v1606_v31 = vrot.slane %v1605_v33, 1  ;;  %v1993_v43 = vadd.f32 %v1992_v36, %v1991_v54  ;;  %v4876_v59 = vpop.f32.mrf.mxu0  ;;  %v1814_v5 = vadd.f32 %v4781_v15, %v4798_v61 }
 0x13e   : > { %v1943_v46 = vadd.f32 %v1942_v21, %v1941_v47  ;;  %v1994_v42 = vsel %vm1075_vm7, %v1975_v10, 0.0  ;;  %v1806_v35 = vadd.f32 %v4795_v0, %v4806_v44  ;;  %v4883_v30 = vpop.f32.mrf.mxu1  ;;  %v1996_v48 = vsel %vm1075_vm7, %v1976_v39, 0.0 }
 0x13f   : > { %v4886_v17 = vadd.f32 %v1553_v51, %v4752_v16  ;;  %v1607_v25 = vadd.f32 %v1606_v31, %v1605_v33  ;;  %v1995_v2 = vadd.f32 %v1994_v42, %v1993_v43  ;;  %v4889_v32 = vpop.f32.mrf.mxu0  ;;  %v3442_v27 = vpack.c.bf16 %v1814_v5, %v1814_v5 }
 0x140   : > { %v1945_v40 = vadd.f32 %v1944_v53, %v1943_v46  ;;  %v3440_v14 = vpack.c.bf16 %v1806_v35, %v1806_v35  ;;  %v1817_v15 = vadd.f32 %v4802_v41, %v4814_v37  ;;  %v4893_v0 = vpop.f32.mrf.mxu1  ;;  %v1809_v44 = vadd.f32 %v4808_v57, %v4825_v28 }
 0x141   : > { %v4896_v61 = vadd.f32 %v1607_v25, %v4775_v56  ;;  %v1997_v16 = vadd.f32 %v1996_v48, %v1995_v2  ;;  %v1830_v23 = vadd.f32 %v4818_v19, %v4832_v18  ;;  %v4902_v8 = vpop.f32.mrf.mxu0  ;;  %3314 = vst.msk [vmem:[%s4554_s14 + $0xa8] sm:$0xf] %vm1042_vm6, %v3442_v27  ;;  %v1822_v56 = vadd.f32 %v4829_v38, %v4841_v34 }
 0x142   : > { %3312 = vst.msk [vmem:[%s4554_s14 + $0xa0] sm:$0xf] %vm1042_vm6, %v3440_v14  ;;  %v1841_v41 = vpack.c.bf16 %v1817_v15, %v1814_v5  ;;  %v3443_v37 = vpack.c.bf16 %v1817_v15, %v1817_v15  ;;  %v1947_v60 = vadd.f32 %v1946_v20, %v1945_v40  ;;  %v4910_v54 = vpop.f32.mrf.mxu1  ;;  %v1840_v28 = vpack.c.bf16 %v1809_v44, %v1806_v35 }
 0x143   : > { %v1999_v57 = vadd.f32 %v1998_v29, %v1997_v16  ;;  %v3441_v9 = vpack.c.bf16 %v1809_v44, %v1809_v44  ;;  %v3446_v19 = vpack.c.bf16 %v1830_v23, %v1830_v23  ;;  %v4912_v18 = vpop.f32.mrf.mxu0  ;;  %v2000_v45 = vsel %vm1075_vm7, %v1978_v63, 0.0 }
 0x144   : > { %3315 = vst.msk [vmem:[%s4554_s14 + $0xac] sm:$0xf] %vm1042_vm6, %v3443_v37  ;;  %v1927_v58 = vunpack.c.l.bf16 %v1841_v41  ;;  %v3444_v52 = vpack.c.bf16 %v1822_v56, %v1822_v56  ;;  %v1833_v22 = vadd.f32 %v4834_v4, %v4850_v55  ;;  %v4919_v38 = vpop.f32.mrf.mxu1  ;;  %v1925_v34 = vunpack.c.l.bf16 %v1840_v28 }
 0x145   : > { %3313 = vst.msk [vmem:[%s4554_s14 + $0xa4] sm:$0xf] %vm1042_vm6, %v3441_v9  ;;  %v1926_v62 = vunpack.c.h.bf16 %v1840_v28  ;;  %v2001_v24 = vadd.f32 %v2000_v45, %v1999_v57  ;;  %3318 = vst.msk [vmem:[%s4554_s14 + $0xb8] sm:$0xf] %vm1042_vm6, %v3446_v19  ;;  %v1825_v36 = vadd.f32 %v4848_v3, %v4858_v7  ;;  %v4927_v53 = vpop.f32.mrf.mxu0  ;;  %v1928_v20 = vunpack.c.h.bf16 %v1841_v41 }
 0x146   : > { %3316 = vst.msk [vmem:[%s4554_s14 + $0xb0] sm:$0xf] %vm1042_vm6, %v3444_v52  ;;  %v4931_v26 = vpop.f32.mrf.mxu1  ;;  %v1948_v4 = vsel %vm1075_vm7, %v1925_v34, 0.0  ;;  %v1979_v55 = vmul.f32 %v1925_v34, %v1925_v34  ;;  %v1981_v63 = vmul.f32 %v1927_v58, %v1927_v58  ;;  %v1843_v7 = vpack.c.bf16 %v1833_v22, %v1830_v23 }
 0x147   : > { %v1980_v49 = vmul.f32 %v1926_v62, %v1926_v62  ;;  %v4934_v33 = vpop.f32.mrf.mxu0  ;;  %v1949_v13 = vadd.f32 %v1948_v4, %v1947_v60  ;;  %v1950_v29 = vsel %vm1075_vm7, %v1926_v62, 0.0  ;;  %v3447_v21 = vpack.c.bf16 %v1833_v22, %v1833_v22 }
 0x148   : > { %v4937_v47 = vpop.f32.mrf.mxu1  ;;  %v2002_v3 = vsel %vm1075_vm7, %v1979_v55, 0.0  ;;  %v1842_v10 = vpack.c.bf16 %v1825_v36, %v1822_v56  ;;  %v1952_v31 = vsel %vm1075_vm7, %v1927_v58, 0.0  ;;  %v1982_v39 = vmul.f32 %v1928_v20, %v1928_v20 }
 0x149   : > { %v4940_v51 = vpop.f32.mrf.mxu0  ;;  %v1951_v43 = vadd.f32 %v1950_v29, %v1949_v13  ;;  %v2003_v46 = vadd.f32 %v2002_v3, %v2001_v24  ;;  %v2004_v5 = vsel %vm1075_vm7, %v1980_v49, 0.0  ;;  %3319 = vst.msk [vmem:[%s4554_s14 + $0xbc] sm:$0xf] %vm1042_vm6, %v3447_v21  ;;  %v3445_v35 = vpack.c.bf16 %v1825_v36, %v1825_v36 }
 0x14a   : > { %v4943_v42 = vpop.f32.mrf.mxu1  ;;  %v1929_v25 = vunpack.c.l.bf16 %v1842_v10  ;;  %v1930_v2 = vunpack.c.h.bf16 %v1842_v10  ;;  %v1954_v15 = vsel %vm1075_vm7, %v1928_v20, 0.0  ;;  %v2006_v16 = vsel %vm1075_vm7, %v1981_v63, 0.0 }
 0x14b   : > { %v4948_v48 = vpop.f32.mrf.mxu0  ;;  %v1953_v40 = vadd.f32 %v1952_v31, %v1951_v43  ;;  %v2005_v27 = vadd.f32 %v2004_v5, %v2003_v46  ;;  %v1931_v44 = vunpack.c.l.bf16 %v1843_v7  ;;  %3317 = vst.msk [vmem:[%s4554_s14 + $0xb4] sm:$0xf] %vm1042_vm6, %v3445_v35  ;;  %v2008_v28 = vsel %vm1075_vm7, %v1982_v39, 0.0 }
 0x14c   : > { %v4950_v14 = vpop.f32.mrf.mxu1  ;;  %v1956_v23 = vsel %vm1075_vm7, %v1929_v25, 0.0  ;;  %v1983_v56 = vmul.f32 %v1929_v25, %v1929_v25  ;;  %v1932_v9 = vunpack.c.h.bf16 %v1843_v7  ;;  %v1984_v19 = vmul.f32 %v1930_v2, %v1930_v2 }
 0x14d   : > { %v4957_v41 = vpop.f32.mrf.mxu0  ;;  %v2007_v37 = vadd.f32 %v2006_v16, %v2005_v27  ;;  %v1955_v60 = vadd.f32 %v1954_v15, %v1953_v40  ;;  %v1985_v62 = vmul.f32 %v1931_v44, %v1931_v44  ;;  %v1958_v24 = vsel %vm1075_vm7, %v1930_v2, 0.0 }
 0x14e   : > { %v4959_v57 = vpop.f32.mrf.mxu1  ;;  %v2010_v22 = vsel %vm1075_vm7, %v1983_v56, 0.0  ;;  %v1960_v49 = vsel %vm1075_vm7, %v1931_v44, 0.0  ;;  %v1986_v63 = vmul.f32 %v1932_v9, %v1932_v9  ;;  %v2012_v13 = vsel %vm1075_vm7, %v1984_v19, 0.0 }
 0x14f   : > { %v4962_v45 = vpop.f32.mrf.mxu0  ;;  %v1957_v58 = vadd.f32 %v1956_v23, %v1955_v60  ;;  %v2009_v52 = vadd.f32 %v2008_v28, %v2007_v37  ;;  %v1962_v10 = vsel %vm1075_vm7, %v1932_v9, 0.0  ;;  %v2014_v31 = vsel %vm1075_vm7, %v1985_v62, 0.0 }
 0x150   : > { %v4965_v34 = vpop.f32.mrf.mxu1  ;;  %v2016_v35 = vsel %vm1075_vm7, %v1986_v63, 0.0  ;;  %v2174_v15 = vadd.f32 %v4852_v11, %v4867_v50  ;;  %v2166_v60 = vadd.f32 %v4862_v12, %v4874_v6 }
 0x151   : > { %v4968_v36 = vpop.f32.mrf.mxu0  ;;  %v1959_v20 = vadd.f32 %v1958_v24, %v1957_v58  ;;  %v2011_v4 = vadd.f32 %v2010_v22, %v2009_v52  ;;  %v2177_v52 = vadd.f32 %v4870_v1, %v4883_v30  ;;  %v2190_v1 = vadd.f32 %v4889_v32, %v4910_v54 }
 0x152   : > { %v4970_v55 = vpop.f32.mrf.mxu1 }
 0x153   : > { %v4974_v29 = vpop.f32.mrf.mxu0  ;;  %v1961_v3 = vadd.f32 %v1960_v49, %v1959_v20  ;;  %v2013_v7 = vadd.f32 %v2012_v13, %v2011_v4  ;;  %v2169_v4 = vadd.f32 %v4876_v59, %v4893_v0  ;;  %v2182_v0 = vadd.f32 %v4902_v8, %v4919_v38 }
 0x154   : > { %v4976_v21 = vpop.f32.mrf.mxu1  ;;  %v2206_v8 = vadd.f32 %v4934_v33, %v4943_v42  ;;  %v5021_v33 = vadd.f32 %v4948_v48, %v4959_v57  ;;  %v5025_v42 = vadd.f32 %v4957_v41, %v4965_v34 }
 0x155   : > { %v4980_v39 = vpop.f32.mrf.mxu0  ;;  %v1963_v43 = vadd.f32 %v1962_v10, %v1961_v3  ;;  %v2015_v46 = vadd.f32 %v2014_v31, %v2013_v7 }
 0x156   : > { %v4982_v5 = vpop.f32.mrf.mxu1 }
 0x157   : > { %v3694_v25 = vpop.f32.mrf.mxu0  ;;  %v1964_v2 = vrot.slane %v1963_v43, 4  ;;  %v2017_v40 = vadd.f32 %v2016_v35, %v2015_v46  ;;  %v2193_v35 = vadd.f32 %v4912_v18, %v4931_v26 }
 0x158   : > { %v4985_v27 = vpop.f32.mrf.mxu1 }
 0x159   : > { %v2409_v16 = vpop.f32.mrf.mxu0  ;;  %v1965_v44 = vadd.f32 %v1964_v2, %v1963_v43  ;;  %v2018_v23 = vrot.slane %v2017_v40, 4 }
 0x15a   : > { %v3676_v37 = vpop.f32.mrf.mxu1 }
 0x15b   : > { %v2332_v56 = vadd.f32 %v3676_v37, %v2174_v15  ;;  %v3695_v28 = vpop.f32.mrf.mxu0  ;;  %v1966_v9 = vrot.slane %v1965_v44, 2  ;;  %v2019_v19 = vadd.f32 %v2018_v23, %v2017_v40  ;;  %v2185_v23 = vadd.f32 %v4927_v53, %v4937_v47 }
 0x15c   : > { %v2267_v58 = vpop.f32.mrf.mxu1 }
 0x15d   : > { %v2474_v22 = vadd.f32 %v3694_v25, %v2332_v56  ;;  %v2330_v62 = vadd.f32 %v2267_v58, %v2166_v60  ;;  %v2412_v24 = vpop.f32.mrf.mxu0  ;;  %v1967_v11 = vadd.f32 %v1966_v9, %v1965_v44  ;;  %v2020_v50 = vrot.slane %v2019_v19, 2 }
 0x15e   : > { %v3677_v20 = vpop.f32.mrf.mxu1 }
 0x15f   : > { %v3450_v49 = vpack.c.bf16 %v2474_v22, %v2474_v22  ;;  %v2472_v12 = vadd.f32 %v2409_v16, %v2330_v62  ;;  %v2333_v6 = vadd.f32 %v3677_v20, %v2177_v52  ;;  %v3698_v63 = vpop.f32.mrf.mxu0  ;;  %v1968_v13 = vrot.slane %v1967_v11, 1 }
 0x160   : > { %v2021_v3 = vadd.f32 %v2020_v50, %v2019_v19  ;;  %v2270_v7 = vpop.f32.mrf.mxu1  ;;  %v5029_v19 = vadd.f32 %v4962_v45, %v4970_v55 }
 0x161   : > { %3373 = vst.msk [vmem:[%s4554_s14 + $0xc8] sm:$0xf] %vm1042_vm6, %v3450_v49  ;;  %v3448_v30 = vpack.c.bf16 %v2472_v12, %v2472_v12  ;;  %v2475_v10 = vadd.f32 %v3695_v28, %v2333_v6  ;;  %v2331_v31 = vadd.f32 %v2270_v7, %v2169_v4  ;;  %v2425_v43 = vpop.f32.mrf.mxu0  ;;  %v1969_v46 = vadd.f32 %v1968_v13, %v1967_v11 }
 0x162   : > { %v2022_v59 = vrot.slane %v2021_v3, 1  ;;  %v3680_v25 = vpop.f32.mrf.mxu1 }
 0x163   : > { %3371 = vst.msk [vmem:[%s4554_s14 + $0xc0] sm:$0xf] %vm1042_vm6, %v3448_v30  ;;  %v2489_v2 = vpack.c.bf16 %v2475_v10, %v2474_v22  ;;  %v3451_v32 = vpack.c.bf16 %v2475_v10, %v2475_v10  ;;  %v2473_v54 = vadd.f32 %v2412_v24, %v2331_v31  ;;  %v2336_v40 = vadd.f32 %v3680_v25, %v2190_v1  ;;  %v3699_v15 = vpop.f32.mrf.mxu0 }
 0x164   : > { %v5006_v16 = vadd.f32 %v1969_v46, %v4886_v17  ;;  %v2023_v44 = vadd.f32 %v2022_v59, %v2021_v3  ;;  %v2283_v38 = vpop.f32.mrf.mxu1  ;;  %v2198_v17 = vadd.f32 %v4940_v51, %v4950_v14 }
 0x165   : > { %3374 = vst.msk [vmem:[%s4554_s14 + $0xcc] sm:$0xf] %vm1042_vm6, %v3451_v32  ;;  %v2571_v18 = vunpack.c.l.bf16 %v2489_v2  ;;  %v2572_v26 = vunpack.c.h.bf16 %v2489_v2  ;;  %v2488_v37 = vpack.c.bf16 %v2473_v54, %v2472_v12  ;;  %v3449_v60 = vpack.c.bf16 %v2473_v54, %v2473_v54  ;;  %v2428_v56 = vpop.f32.mrf.mxu0 }
 0x166   : > { %v5015_v28 = vadd.f32 %v2023_v44, %v4896_v61  ;;  %v2478_v9 = vadd.f32 %v3698_v63, %v2336_v40  ;;  %v2334_v53 = vadd.f32 %v2283_v38, %v2182_v0  ;;  %v3681_v47 = vpop.f32.mrf.mxu1 }
 0x167   : > { %v2625_v61 = vmul.f32 %v2571_v18, %v2571_v18  ;;  %3372 = vst.msk [vmem:[%s4554_s14 + $0xc4] sm:$0xf] %vm1042_vm6, %v3449_v60  ;;  %v3702_v51 = vpop.f32.mrf.mxu0  ;;  %v2569_v14 = vunpack.c.l.bf16 %v2488_v37  ;;  %v2570_v58 = vunpack.c.h.bf16 %v2488_v37  ;;  %v2588_v48 = vsel %vm1075_vm7, %v2571_v18, 0.0 }
 0x168   : > { %v3454_v52 = vpack.c.bf16 %v2478_v9, %v2478_v9  ;;  %v2476_v22 = vadd.f32 %v2425_v43, %v2334_v53  ;;  %v2286_v62 = vpop.f32.mrf.mxu1  ;;  %v2626_v57 = vmul.f32 %v2572_v26, %v2572_v26  ;;  %v2337_v24 = vadd.f32 %v3681_v47, %v2193_v35 }
 0x169   : > { %v2335_v41 = vadd.f32 %v2286_v62, %v2185_v23  ;;  %v2441_v34 = vpop.f32.mrf.mxu0  ;;  %v2585_v11 = vsel %vm1075_vm7, %v2569_v14, 0.0  ;;  %v2586_v45 = vsel %vm1075_vm7, %v2570_v58, 0.0  ;;  %v2623_v55 = vmul.f32 %v2569_v14, %v2569_v14 }
 0x16a   : > { %v2624_v50 = vmul.f32 %v2570_v58, %v2570_v58  ;;  %3377 = vst.msk [vmem:[%s4554_s14 + $0xd8] sm:$0xf] %vm1042_vm6, %v3454_v52  ;;  %v3684_v20 = vpop.f32.mrf.mxu1  ;;  %v2587_v4 = vadd.f32 %v2586_v45, %v2585_v11  ;;  %v3452_v49 = vpack.c.bf16 %v2476_v22, %v2476_v22  ;;  %v2479_v12 = vadd.f32 %v3699_v15, %v2337_v24 }
 0x16b   : > { %v2477_v6 = vadd.f32 %v2428_v56, %v2335_v41  ;;  %v3703_v63 = vpop.f32.mrf.mxu0  ;;  %v2642_v13 = vsel %vm1075_vm7, %v2625_v61, 0.0  ;;  %v2639_v3 = vsel %vm1075_vm7, %v2623_v55, 0.0  ;;  %v2340_v1 = vadd.f32 %v3684_v20, %v2206_v8 }
 0x16c   : > { %v2640_v7 = vsel %vm1075_vm7, %v2624_v50, 0.0  ;;  %v2299_v30 = vpop.f32.mrf.mxu1  ;;  %v2589_v10 = vadd.f32 %v2588_v48, %v2587_v4  ;;  %3375 = vst.msk [vmem:[%s4554_s14 + $0xd0] sm:$0xf] %vm1042_vm6, %v3452_v49  ;;  %v2491_v43 = vpack.c.bf16 %v2479_v12, %v2478_v9  ;;  %v3455_v46 = vpack.c.bf16 %v2479_v12, %v2479_v12 }
 0x16d   : > { %v2641_v31 = vadd.f32 %v2640_v7, %v2639_v3  ;;  %v2490_v59 = vpack.c.bf16 %v2477_v6, %v2476_v22  ;;  %v3453_v0 = vpack.c.bf16 %v2477_v6, %v2477_v6  ;;  %v2482_v35 = vadd.f32 %v3702_v51, %v2340_v1  ;;  %v2444_v32 = vpop.f32.mrf.mxu0 }
 0x16e   : > { %v2338_v25 = vadd.f32 %v2299_v30, %v2198_v17  ;;  %v3685_v2 = vpop.f32.mrf.mxu1  ;;  %v2590_v54 = vsel %vm1075_vm7, %v2572_v26, 0.0  ;;  %3378 = vst.msk [vmem:[%s4554_s14 + $0xdc] sm:$0xf] %vm1042_vm6, %v3455_v46  ;;  %v2575_v15 = vunpack.c.l.bf16 %v2491_v43  ;;  %v2576_v44 = vunpack.c.h.bf16 %v2491_v43 }
 0x16f   : > { %v2643_v40 = vadd.f32 %v2642_v13, %v2641_v31  ;;  %3376 = vst.msk [vmem:[%s4554_s14 + $0xd4] sm:$0xf] %vm1042_vm6, %v3453_v0  ;;  %v2573_v23 = vunpack.c.l.bf16 %v2490_v59  ;;  %v2574_v8 = vunpack.c.h.bf16 %v2490_v59  ;;  %v3458_v38 = vpack.c.bf16 %v2482_v35, %v2482_v35  ;;  %v3706_v14 = vpop.f32.mrf.mxu0 }
 0x170   : > { %v2480_v18 = vadd.f32 %v2441_v34, %v2338_v25  ;;  %v2302_v37 = vpop.f32.mrf.mxu1  ;;  %v2214_v60 = vadd.f32 %v4968_v36, %v4976_v21  ;;  %v2225_v56 = vadd.f32 %v4974_v29, %v4982_v5  ;;  %v2644_v26 = vsel %vm1075_vm7, %v2626_v57, 0.0 }
 0x171   : > { %v2591_v17 = vadd.f32 %v2590_v54, %v2589_v10  ;;  %v2629_v9 = vmul.f32 %v2575_v15, %v2575_v15  ;;  %v2592_v53 = vsel %vm1075_vm7, %v2573_v23, 0.0  ;;  %v2627_v47 = vmul.f32 %v2573_v23, %v2573_v23  ;;  %3381 = vst.msk [vmem:[%s4554_s14 + $0xe8] sm:$0xf] %vm1042_vm6, %v3458_v38  ;;  %v2457_v20 = vpop.f32.mrf.mxu0 }
 0x172   : > { %v2628_v61 = vmul.f32 %v2574_v8, %v2574_v8  ;;  %v3688_v51 = vpop.f32.mrf.mxu1  ;;  %v2596_v58 = vsel %vm1075_vm7, %v2575_v15, 0.0  ;;  %v2630_v52 = vmul.f32 %v2576_v44, %v2576_v44  ;;  %v2645_v21 = vadd.f32 %v2644_v26, %v2643_v40 }
 0x173   : > { %v2593_v36 = vadd.f32 %v2592_v53, %v2591_v17  ;;  %v2594_v29 = vsel %vm1075_vm7, %v2574_v8, 0.0  ;;  %v2646_v5 = vsel %vm1075_vm7, %v2627_v47, 0.0  ;;  %v3456_v22 = vpack.c.bf16 %v2480_v18, %v2480_v18  ;;  %v3707_v59 = vpop.f32.mrf.mxu0 }
 0x174   : > { %v2341_v62 = vadd.f32 %v3685_v2, %v5021_v33  ;;  %v2315_v48 = vpop.f32.mrf.mxu1  ;;  %v2647_v24 = vadd.f32 %v2646_v5, %v2645_v21  ;;  %v2339_v41 = vadd.f32 %v2302_v37, %v5025_v42  ;;  %v2344_v34 = vadd.f32 %v3688_v51, %v5029_v19 }
 0x175   : > { %v2595_v57 = vadd.f32 %v2594_v29, %v2593_v36  ;;  %v2650_v11 = vsel %vm1075_vm7, %v2629_v9, 0.0  ;;  %v2648_v45 = vsel %vm1075_vm7, %v2628_v61, 0.0  ;;  %3379 = vst.msk [vmem:[%s4554_s14 + $0xe0] sm:$0xf] %vm1042_vm6, %v3456_v22  ;;  %v2342_v50 = vadd.f32 %v2315_v48, %v2214_v60  ;;  %v2460_v9 = vpop.f32.mrf.mxu0 }
 0x176   : > { %v2483_v55 = vadd.f32 %v3703_v63, %v2341_v62  ;;  %v3689_v4 = vpop.f32.mrf.mxu1  ;;  %v2649_v33 = vadd.f32 %v2648_v45, %v2647_v24  ;;  %v2481_v12 = vadd.f32 %v2444_v32, %v2339_v41  ;;  %v2486_v6 = vadd.f32 %v3706_v14, %v2344_v34 }
 0x177   : > { %v2597_v49 = vadd.f32 %v2596_v58, %v2595_v57  ;;  %v2484_v3 = vadd.f32 %v2457_v20, %v2342_v50  ;;  %v2345_v19 = vadd.f32 %v3689_v4, %v2225_v56  ;;  %v2598_v7 = vsel %vm1075_vm7, %v2576_v44, 0.0 }
 0x178   : > { %v2493_v13 = vpack.c.bf16 %v2483_v55, %v2482_v35  ;;  %v3459_v42 = vpack.c.bf16 %v2483_v55, %v2483_v55  ;;  %v2651_v1 = vadd.f32 %v2650_v11, %v2649_v33  ;;  %v2492_v30 = vpack.c.bf16 %v2481_v12, %v2480_v18  ;;  %v2318_v40 = vpop.f32.mrf.mxu1 }
 0x179   : > { %v3457_v63 = vpack.c.bf16 %v2481_v12, %v2481_v12  ;;  %v2599_v31 = vadd.f32 %v2598_v7, %v2597_v49  ;;  %v3462_v43 = vpack.c.bf16 %v2486_v6, %v2486_v6  ;;  %v3460_v46 = vpack.c.bf16 %v2484_v3, %v2484_v3 }
 0x17a   : > { %3382 = vst.msk [vmem:[%s4554_s14 + $0xec] sm:$0xf] %vm1042_vm6, %v3459_v42  ;;  %v2579_v10 = vunpack.c.l.bf16 %v2493_v13  ;;  %v2652_v0 = vsel %vm1075_vm7, %v2630_v52, 0.0  ;;  %v2577_v35 = vunpack.c.l.bf16 %v2492_v30  ;;  %v2578_v25 = vunpack.c.h.bf16 %v2492_v30 }
 0x17b   : > { %3380 = vst.msk [vmem:[%s4554_s14 + $0xe4] sm:$0xf] %vm1042_vm6, %v3457_v63  ;;  %v2487_v2 = vadd.f32 %v3707_v59, %v2345_v19  ;;  %v2217_v32 = vadd.f32 %v4980_v39, %v4985_v27  ;;  %v2653_v54 = vadd.f32 %v2652_v0, %v2651_v1  ;;  %3385 = vst.msk [vmem:[%s4554_s14 + $0xf8] sm:$0xf] %vm1042_vm6, %v3462_v43  ;;  %v2580_v15 = vunpack.c.h.bf16 %v2493_v13 }
 0x17c   : > { %3383 = vst.msk [vmem:[%s4554_s14 + $0xf0] sm:$0xf] %vm1042_vm6, %v3460_v46  ;;  %v2600_v44 = vsel %vm1075_vm7, %v2577_v35, 0.0  ;;  %v2631_v23 = vmul.f32 %v2577_v35, %v2577_v35  ;;  %v2632_v8 = vmul.f32 %v2578_v25, %v2578_v25  ;;  %v2633_v38 = vmul.f32 %v2579_v10, %v2579_v10 }
 0x17d   : > { %v2601_v18 = vadd.f32 %v2600_v44, %v2599_v31  ;;  %v2602_v37 = vsel %vm1075_vm7, %v2578_v25, 0.0  ;;  %v3463_v56 = vpack.c.bf16 %v2487_v2, %v2487_v2  ;;  %v2343_v39 = vadd.f32 %v2318_v40, %v2217_v32 }
 0x17e   : > { %v2654_v60 = vsel %vm1075_vm7, %v2631_v23, 0.0  ;;  %v2604_v27 = vsel %vm1075_vm7, %v2579_v10, 0.0  ;;  %v2634_v53 = vmul.f32 %v2580_v15, %v2580_v15  ;;  %v2656_v47 = vsel %vm1075_vm7, %v2632_v8, 0.0 }
 0x17f   : > { %v2603_v26 = vadd.f32 %v2602_v37, %v2601_v18  ;;  %v2655_v17 = vadd.f32 %v2654_v60, %v2653_v54  ;;  %v2495_v61 = vpack.c.bf16 %v2487_v2, %v2486_v6  ;;  %3386 = vst.msk [vmem:[%s4554_s14 + $0xfc] sm:$0xf] %vm1042_vm6, %v3463_v56  ;;  %v2485_v51 = vadd.f32 %v2460_v9, %v2343_v39  ;;  %v2729_v18 = vld [vmem:[%s4554_s14 + $0x18] sm:$0xff] (%p3923_p5)   ;;  %v2733_v37 = vld [vmem:[%s4554_s14 + $0x20] sm:$0xff] (%p3923_p5)   ;;  %v2737_v60 = vld [vmem:[%s4554_s14 + $0x28] sm:$0xff] (%p3923_p5)  }
 0x180   : > { %v2606_v52 = vsel %vm1075_vm7, %v2580_v15, 0.0  ;;  %v2658_v36 = vsel %vm1075_vm7, %v2633_v38, 0.0  ;;  %v2660_v62 = vsel %vm1075_vm7, %v2634_v53, 0.0  ;;  %v2725_v38 = vld [vmem:[%s4554_s14 + $0x10] sm:$0xff] (%p3923_p5)   ;;  %v2745_v39 = vld [vmem:[%s4554_s14 + $0x38] sm:$0xff] (%p3923_p5)   ;;  %2730 = vst [vmem:[%s5122_s7 + $0x18] sm:$0xff] (%p3923_p5), %v2729_v18  }
 0x181   : > { %v2605_v14 = vadd.f32 %v2604_v27, %v2603_v26  ;;  %v2657_v58 = vadd.f32 %v2656_v47, %v2655_v17  ;;  %v2494_v21 = vpack.c.bf16 %v2485_v51, %v2484_v3  ;;  %v3461_v29 = vpack.c.bf16 %v2485_v51, %v2485_v51  ;;  %v2741_v56 = vld [vmem:[%s4554_s14 + $0x30] sm:$0xff] (%p3923_p5)   ;;  %v2749_v27 = vld [vmem:[%s4554_s14 + $0x40] sm:$0xff] (%p3923_p5)   ;;  %v2753_v26 = vld [vmem:[%s4554_s14 + $0x48] sm:$0xff] (%p3923_p5)   ;;  %2726 = vst [vmem:[%s5122_s7 + $0x10] sm:$0xff] (%p3923_p5), %v2725_v38  }
 0x182   : > { %v2583_v48 = vunpack.c.l.bf16 %v2495_v61  ;;  %v2584_v34 = vunpack.c.h.bf16 %v2495_v61  ;;  %v2757_v17 = vld [vmem:[%s4554_s14 + $0x50] sm:$0xff] (%p3923_p5)   ;;  %v2761_v9 = vld [vmem:[%s4554_s14 + $0x58] sm:$0xff] (%p3923_p5)   ;;  %2734 = vst [vmem:[%s5122_s7 + $0x20] sm:$0xff] (%p3923_p5), %v2733_v37   ;;  %2738 = vst [vmem:[%s5122_s7 + $0x28] sm:$0xff] (%p3923_p5), %v2737_v60  }
 0x183   : > { %v2659_v5 = vadd.f32 %v2658_v36, %v2657_v58  ;;  %v2607_v22 = vadd.f32 %v2606_v52, %v2605_v14  ;;  %3384 = vst.msk [vmem:[%s4554_s14 + $0xf4] sm:$0xf] %vm1042_vm6, %v3461_v29  ;;  %v2581_v57 = vunpack.c.l.bf16 %v2494_v21  ;;  %v2582_v24 = vunpack.c.h.bf16 %v2494_v21  ;;  %2742 = vst [vmem:[%s5122_s7 + $0x30] sm:$0xff] (%p3923_p5), %v2741_v56   ;;  %v2765_v53 = vld [vmem:[%s4554_s14 + $0x60] sm:$0xff] (%p3923_p5)   ;;  %v2769_v47 = vld [vmem:[%s4554_s14 + $0x68] sm:$0xff] (%p3923_p5)  }
 0x184   : > { %v2637_v20 = vmul.f32 %v2583_v48, %v2583_v48  ;;  %v2612_v6 = vsel %vm1075_vm7, %v2583_v48, 0.0  ;;  %v2638_v13 = vmul.f32 %v2584_v34, %v2584_v34  ;;  %v2614_v7 = vsel %vm1075_vm7, %v2584_v34, 0.0  ;;  %2746 = vst [vmem:[%s5122_s7 + $0x38] sm:$0xff] (%p3923_p5), %v2745_v39   ;;  %2750 = vst [vmem:[%s5122_s7 + $0x80] sm:$0xff] (%p3923_p5), %v2749_v27   ;;  %v2773_v61 = vld [vmem:[%s4554_s14 + $0x70] sm:$0xff] (%p3923_p5)   ;;  %v2777_v51 = vld [vmem:[%s4554_s14 + $0x78] sm:$0xff] (%p3923_p5)  }
 0x185   : > { %v2661_v41 = vadd.f32 %v2660_v62, %v2659_v5  ;;  %v2608_v11 = vsel %vm1075_vm7, %v2581_v57, 0.0  ;;  %v2635_v45 = vmul.f32 %v2581_v57, %v2581_v57  ;;  %v2636_v55 = vmul.f32 %v2582_v24, %v2582_v24  ;;  %2754 = vst [vmem:[%s5122_s7 + $0x88] sm:$0xff] (%p3923_p5), %v2753_v26   ;;  %2758 = vst [vmem:[%s5122_s7 + $0x90] sm:$0xff] (%p3923_p5), %v2757_v17   ;;  %v2781_v14 = vld [vmem:[%s4554_s14 + $0x80] sm:$0xff] (%p3923_p5)   ;;  %v2785_v58 = vld [vmem:[%s4554_s14 + $0x88] sm:$0xff] (%p3923_p5)  }
 0x186   : > { %v2609_v50 = vadd.f32 %v2608_v11, %v2607_v22  ;;  %v2610_v4 = vsel %vm1075_vm7, %v2582_v24, 0.0  ;;  %v2666_v1 = vsel %vm1075_vm7, %v2637_v20, 0.0  ;;  %v2668_v10 = vsel %vm1075_vm7, %v2638_v13, 0.0  ;;  %2762 = vst [vmem:[%s5122_s7 + $0x98] sm:$0xff] (%p3923_p5), %v2761_v9   ;;  %2766 = vst [vmem:[%s5122_s7 + $0xa0] sm:$0xff] (%p3923_p5), %v2765_v53   ;;  %v2789_v52 = vld [vmem:[%s4554_s14 + $0x90] sm:$0xff] (%p3923_p5)  }
 0x187   : > { %v2662_v49 = vsel %vm1075_vm7, %v2635_v45, 0.0  ;;  %v2664_v42 = vsel %vm1075_vm7, %v2636_v55, 0.0  ;;  %2770 = vst [vmem:[%s5122_s7 + $0xa8] sm:$0xff] (%p3923_p5), %v2769_v47   ;;  %2774 = vst [vmem:[%s5122_s7 + $0xb0] sm:$0xff] (%p3923_p5), %v2773_v61   ;;  %v2793_v36 = vld [vmem:[%s4554_s14 + $0x98] sm:$0xff] (%p3923_p5)   ;;  %v2797_v21 = vld [vmem:[%s4554_s14 + $0xa0] sm:$0xff] (%p3923_p5)  }
 0x188   : > { %v2611_v33 = vadd.f32 %v2610_v4, %v2609_v50  ;;  %v2663_v12 = vadd.f32 %v2662_v49, %v2661_v41  ;;  %2778 = vst [vmem:[%s5122_s7 + $0xb8] sm:$0xff] (%p3923_p5), %v2777_v51   ;;  %2782 = vst [vmem:[%s5122_s7 + $0x100] sm:$0xff] (%p3923_p5), %v2781_v14   ;;  %v2801_v29 = vld [vmem:[%s4554_s14 + $0xa8] sm:$0xff] (%p3923_p5)   ;;  %v2805_v5 = vld [vmem:[%s4554_s14 + $0xb0] sm:$0xff] (%p3923_p5)  }
 0x189   : > { %2786 = vst [vmem:[%s5122_s7 + $0x108] sm:$0xff] (%p3923_p5), %v2785_v58   ;;  %2790 = vst [vmem:[%s5122_s7 + $0x110] sm:$0xff] (%p3923_p5), %v2789_v52   ;;  %v2809_v22 = vld [vmem:[%s4554_s14 + $0xb8] sm:$0xff] (%p3923_p5)   ;;  %v2813_v62 = vld [vmem:[%s4554_s14 + $0xc0] sm:$0xff] (%p3923_p5)  }
 0x18a   : > { %v2613_v3 = vadd.f32 %v2612_v6, %v2611_v33  ;;  %v2665_v19 = vadd.f32 %v2664_v42, %v2663_v12  ;;  %2794 = vst [vmem:[%s5122_s7 + $0x118] sm:$0xff] (%p3923_p5), %v2793_v36   ;;  %2798 = vst [vmem:[%s5122_s7 + $0x120] sm:$0xff] (%p3923_p5), %v2797_v21   ;;  %v2817_v48 = vld [vmem:[%s4554_s14 + $0xc8] sm:$0xff] (%p3923_p5)   ;;  %v2821_v57 = vld [vmem:[%s4554_s14 + $0xd0] sm:$0xff] (%p3923_p5)  }
 0x18b   : > { %2802 = vst [vmem:[%s5122_s7 + $0x128] sm:$0xff] (%p3923_p5), %v2801_v29   ;;  %2806 = vst [vmem:[%s5122_s7 + $0x130] sm:$0xff] (%p3923_p5), %v2805_v5   ;;  %v2825_v24 = vld [vmem:[%s4554_s14 + $0xd8] sm:$0xff] (%p3923_p5)   ;;  %v2829_v41 = vld [vmem:[%s4554_s14 + $0xe0] sm:$0xff] (%p3923_p5)  }
 0x18c   : > { %v2615_v30 = vadd.f32 %v2614_v7, %v2613_v3  ;;  %v2667_v63 = vadd.f32 %v2666_v1, %v2665_v19  ;;  %2810 = vst [vmem:[%s5122_s7 + $0x138] sm:$0xff] (%p3923_p5), %v2809_v22   ;;  %2814 = vst [vmem:[%s5122_s7 + $0x180] sm:$0xff] (%p3923_p5), %v2813_v62   ;;  %v2833_v34 = vld [vmem:[%s4554_s14 + $0xe8] sm:$0xff] (%p3923_p5)   ;;  %v2837_v11 = vld [vmem:[%s4554_s14 + $0xf0] sm:$0xff] (%p3923_p5)  }
 0x18d   : > { %2818 = vst [vmem:[%s5122_s7 + $0x188] sm:$0xff] (%p3923_p5), %v2817_v48   ;;  %2822 = vst [vmem:[%s5122_s7 + $0x190] sm:$0xff] (%p3923_p5), %v2821_v57   ;;  %v2841_v45 = vld [vmem:[%s4554_s14 + $0xf8] sm:$0xff] (%p3923_p5)  }
 0x18e   : > { %v2616_v31 = vrot.slane %v2615_v30, 4  ;;  %v2669_v43 = vadd.f32 %v2668_v10, %v2667_v63  ;;  %2826 = vst [vmem:[%s5122_s7 + $0x198] sm:$0xff] (%p3923_p5), %v2825_v24   ;;  %2830 = vst [vmem:[%s5122_s7 + $0x1a0] sm:$0xff] (%p3923_p5), %v2829_v41  }
 0x18f   : > { %2834 = vst [vmem:[%s5122_s7 + $0x1a8] sm:$0xff] (%p3923_p5), %v2833_v34   ;;  %2838 = vst [vmem:[%s5122_s7 + $0x1b0] sm:$0xff] (%p3923_p5), %v2837_v11  }
 0x190   : > { %v2617_v46 = vadd.f32 %v2616_v31, %v2615_v30  ;;  %v2670_v59 = vrot.slane %v2669_v43, 4  ;;  %2842 = vst [vmem:[%s5122_s7 + $0x1b8] sm:$0xff] (%p3923_p5), %v2841_v45  }
 0x192   : > { %v2618_v0 = vrot.slane %v2617_v46, 2  ;;  %v2671_v35 = vadd.f32 %v2670_v59, %v2669_v43 }
 0x194   : > { %v2619_v25 = vadd.f32 %v2618_v0, %v2617_v46  ;;  %v2672_v2 = vrot.slane %v2671_v35, 2 }
 0x196   : > { %v2620_v32 = vrot.slane %v2619_v25, 1  ;;  %v2673_v54 = vadd.f32 %v2672_v2, %v2671_v35 }
 0x198   : > { %v2621_v40 = vadd.f32 %v2620_v32, %v2619_v25  ;;  %v2674_v15 = vrot.slane %v2673_v54, 1 }
 0x19a   : > { %v2622_v44 = vadd.f32 %v2621_v40, %v5006_v16  ;;  %v2675_v23 = vadd.f32 %v2674_v15, %v2673_v54  ;;  %2694 = sbr.rel (!%p3923_p5) target bundleno = 415 (0x19f), region = 36  ;;  %v2717_v16 = vld [vmem:[%s4554_s14] sm:$0xff] (%p3923_p5)  }
 0x19b   : > { %2718 = vst [vmem:[%s5122_s7] sm:$0xff] (%p3923_p5), %v2717_v16  }
 0x19c   : > { %v2676_v8 = vadd.f32 %v2675_v23, %v5015_v28  ;;  %2678 = vst.msk [vmem:[%s319_s6] sm:$0x1] %vm2677_vm8, %v2622_v44  ;;  %v2721_v28 = vld [vmem:[%s4554_s14 + $0x8] sm:$0xff] (%p3923_p5)  }
 0x19d   : > { %2722 = vst [vmem:[%s5122_s7 + $0x8] sm:$0xff] (%p3923_p5), %v2721_v28  }
 0x19e   : > { %2679 = vst.msk [vmem:[%s319_s6 + $0x1] sm:$0x1] %vm2677_vm8, %v2676_v8 }
 0x19f PF: > { %s15_s21 = sadd.s32 1, %s3850_s21   ;;  %s5224_s15 = smov %s3830_s16 }
 0x1a0   : > { %p12_p13 = scmp.ge.s32.totalorder %s15_s21, 6   ;;  %s5225_s16 = smov %s3934_s30 }
 0x1a1   : > { %s5226_s17 = smov %s3842_s19  ;;  %s5227_s18 = smov %s3846_s20 }
 0x1a2   : > { %s5228_s19 = smov %s5231_s22  ;;  %s5229_s20 = smov %s5235_s23 }
 0x1a3   :  { %14 = sbr.rel (!%p12_p13) target bundleno = 4 (0x4), region = 130 }

</bundles_post_ra>
